<compile_context>
chip_gen: v7x
topology: tpu7x:2x2x1
jax: 0.10.0
libtpu: 0.0.40
codegen_flags: <defaults>
</compile_context>

<pallas_src>
import functools

import jax
import jax.numpy as jnp
import numpy as np
from jax.experimental import pallas as pl
from jax.experimental.pallas import tpu as pltpu

_BN_EPS = 1e-5


# ---------------------------------------------------------------------------
# Fused kernel: conv1(s=2) + BN1 + ReLU + conv2(s=1) + BN2 + ReLU
# ---------------------------------------------------------------------------
def _strided_down_kernel(x_ref, w1_ref, s1_ref, w2_ref, s2_ref, mask_ref,
                         o_ref, z_ref, *, ho, wo):
    # x_ref   : (Mblk, 9*Cin)          bf16  conv1 im2col rows (Mblk = Bblk*Ho*Wo)
    # w1_ref  : (9*Cin, Cp)            bf16  BN1 scale folded in
    # s1_ref  : (1, Cp)                f32   BN1 shift
    # w2_ref  : (3, 3*Cp, Cp)          bf16  BN2 scale folded in, kw packed along K
    # s2_ref  : (1, Cp)                f32   BN2 shift
    # mask_ref: (Ho*Wo, 2)             bf16  row-edge masks (col0: w!=Wo-1, col1: w!=0)
    # o_ref   : (Mblk, Cout)           f32   only the real channels are written back
    # z_ref   : (Bblk, (Ho+2)*Wo, 3*Cp) bf16 scratch: y1 zero-padded, replicated at 3
    #           column shifts so conv2's kw taps live in the lane (K) dimension.
    cout = o_ref.shape[-1]
    cp = w1_ref.shape[-1]
    bblk = z_ref.shape[0]
    m_img = ho * wo
    zdt = z_ref.dtype

    w1 = w1_ref[...]
    s1 = s1_ref[...]
    s2 = s2_ref[...]
    mask_l = mask_ref[:, 0:1]            # zero at w == Wo-1 (never used by kw=0 tap)
    mask_r = mask_ref[:, 1:2]            # zero at w == 0    (never used by kw=2 tap)

    for b in range(bblk):                # static unroll; bblk is small
        # ---- conv1: one K-packed matmul over im2col rows + BN1 shift + ReLU --------
        xb = x_ref[b * m_img:(b + 1) * m_img, :]
        acc1 = jnp.dot(xb, w1, preferred_element_type=jnp.float32)
        y1 = jnp.maximum(acc1 + s1, 0.0).astype(zdt)                   # (m_img, Cp)
        y1_l = y1 * mask_l               # for the kw=0 channel block
        y1_r = y1 * mask_r               # for the kw=2 channel block

        # Scratch row r = h*Wo + w (h in [0, Ho+2)); channel block kw holds
        # y1pad[h, w+kw, :], i.e. conv2's kw shifts are folded into the K dimension.
        z_ref[b, wo + 1:wo + 1 + m_img, 0 * cp:1 * cp] = y1_l          # kw = 0
        z_ref[b, wo + 0:wo + 0 + m_img, 1 * cp:2 * cp] = y1            # kw = 1
        z_ref[b, wo - 1:wo - 1 + m_img, 2 * cp:3 * cp] = y1_r          # kw = 2

        # The two single edge cells not covered by the shifted stores above.
        z_ref[b, wo:wo + 1, 0:cp] = jnp.zeros((1, cp), zdt)                    # pad (h=1, w=0), kw=0
        z_ref[b, (ho + 1) * wo - 1:(ho + 1) * wo, 2 * cp:3 * cp] = \
            jnp.zeros((1, cp), zdt)                                            # pad (h=Ho, w=Wo-1), kw=2

        # Halo-only zeroing (rows h = 0 and h = Ho+1), AFTER the stores above (which
        # spill one row-edge element into them).  The interior is fully rewritten every
        # step, so this stays correct when the grid is split across TensorCores.
        z_ref[b, 0:wo, :] = jnp.zeros((wo, 3 * cp), zdt)
        z_ref[b, (ho + 1) * wo:(ho + 2) * wo, :] = jnp.zeros((wo, 3 * cp), zdt)

        # ---- conv2: 3 kh taps, each ONE K = 3*Cp matmul over the VMEM scratch ------
        acc2 = jnp.zeros((m_img, cp), jnp.float32)
        for kh in range(3):
            tap = z_ref[b, kh * wo:kh * wo + m_img, :]                 # (m_img, 3*Cp)
            acc2 += jnp.dot(tap, w2_ref[kh], preferred_element_type=jnp.float32)
        y2 = jnp.maximum(acc2 + s2, 0.0)                               # BN2 + ReLU

        # Store only the real Cout channels (lane-masked store beats 16x writeback).
        o_ref[b * m_img:(b + 1) * m_img, :] = y2[:, :cout].astype(o_ref.dtype)


# ---------------------------------------------------------------------------
# JAX wrapper: im2col for conv1, BN folding, channel padding, batch blocking
# ---------------------------------------------------------------------------
def _round_up(v, m):
    return ((v + m - 1) // m) * m


def _pick_batch_block(n, m_img, target_rows=512, max_block=8):
    """Largest divisor of n (capped) whose total row count stays near the MXU sweet spot."""
    best = 1
    for b in range(1, n + 1):
        if n % b == 0 and b <= max_block and b * m_img <= max(target_rows, m_img):
            best = b
    return best


def _fold_scale(w_oihw, gamma, var):
    """PyTorch (Cout, Cin, 3, 3) -> (3, 3, Cin, Cout) with the BN scale folded in."""
    scale = gamma / jnp.sqrt(var + _BN_EPS)
    return jnp.transpose(w_oihw, (2, 3, 1, 0)) * scale[None, None, None, :]


def _bn_shift(gamma, beta, mean, var):
    scale = gamma / jnp.sqrt(var + _BN_EPS)
    return beta - mean * scale


@jax.jit
def strided_down_forward(x_nchw, params):
    N, Cin, H, W = x_nchw.shape
    Cout = params["w1"].shape[0]
    Ho, Wo = (H + 1) // 2, (W + 1) // 2          # conv 3x3, stride 2, padding 1
    Cp = _round_up(Cout, 128)                    # internal (MXU / lane) channel width
    Kin = 9 * Cin
    m_img = Ho * Wo

    # conv1 im2col (stride 2, padding 1), bf16, K packed into the trailing dim.  With
    # small Cin this is only 9*Cin bytes/pixel of HBM, cheap next to the Cp-wide
    # intermediate that never leaves VMEM; for very large Cin prefer in-kernel taps.
    x = jnp.transpose(x_nchw.astype(jnp.bfloat16), (0, 2, 3, 1))                # NHWC
    xp = jnp.pad(x, ((0, 0), (1, 1), (1, 1), (0, 0)))
    taps = [xp[:, kh:kh + 2 * Ho - 1:2, kw:kw + 2 * Wo - 1:2, :]
            for kh in range(3) for kw in range(3)]
    x_col = jnp.concatenate(taps, axis=-1).reshape(N * m_img, Kin)     # (M_total, 9*Cin)

    # Fold BN scales into the conv weights; pad channels to Cp.  Padded y1 channels are
    # exactly zero after ReLU (zero weights + zero shift) and padded w2 rows are zero,
    # so the padding never contributes to the result.
    w1 = jnp.pad(_fold_scale(params["w1"], params["gamma1"], params["var1"]),
                 ((0, 0), (0, 0), (0, 0), (0, Cp - Cout)))
    w1 = w1.reshape(Kin, Cp).astype(jnp.bfloat16)
    s1 = jnp.pad(_bn_shift(params["gamma1"], params["beta1"], params["mean1"],
                           params["var1"]), (0, Cp - Cout))
    s1 = s1.reshape(1, Cp).astype(jnp.float32)
    w2 = jnp.pad(_fold_scale(params["w2"], params["gamma2"], params["var2"]),
                 ((0, 0), (0, 0), (0, Cp - Cout), (0, Cp - Cout)))
    w2 = w2.reshape(3, 3 * Cp, Cp).astype(jnp.bfloat16)    # rows: kw*Cp + cin, per kh
    s2 = jnp.pad(_bn_shift(params["gamma2"], params["beta2"], params["mean2"],
                           params["var2"]), (0, Cp - Cout))
    s2 = s2.reshape(1, Cp).astype(jnp.float32)

    # Row-edge masks (w index within a row) used to zero the columns the shifted
    # scratch stores must not carry across row boundaries (conv left/right padding).
    w_idx = jnp.arange(m_img, dtype=jnp.int32) % Wo
    edge_mask = jnp.stack([w_idx != Wo - 1, w_idx != 0], axis=1).astype(jnp.bfloat16)

    # Batch-block: several images per grid step amortize per-step pipeline overhead.
    bblk = _pick_batch_block(N, m_img)
    if (bblk * m_img) % 8 != 0 and bblk != N:
        bblk = N                                 # keep the row block (8,128)-legal
    mblk = bblk * m_img
    grid = (N // bblk,)

    # VMEM budget (double-buffered blocks + weights + scratch + live accumulators).
    est = (2 * mblk * max(Kin, 128) * 2 + 2 * mblk * max(Cout, 128) * 4
           + 2 * (Kin * Cp + 9 * Cp * Cp) * 2 + 4 * Cp * 4
           + bblk * (Ho + 2) * Wo * 3 * Cp * 2
           + 3 * m_img * Cp * 4 + m_img * 3 * Cp * 2)
    vmem_limit = int(min(64 * 2 ** 20, max(32 * 2 ** 20, 2 * est)))
    flops = 2 * N * m_img * (Kin * Cp + 9 * Cp * Cp)
    bytes_accessed = int(x_col.size * 2 + w1.size * 2 + w2.size * 2
                         + (s1.size + s2.size) * 4 + edge_mask.size * 2
                         + N * m_img * Cout * 4)

    kernel = functools.partial(_strided_down_kernel, ho=Ho, wo=Wo)
    out = pl.pallas_call(
        kernel,
        out_shape=jax.ShapeDtypeStruct((N * m_img, Cout), jnp.float32),
        grid_spec=pltpu.PrefetchScalarGridSpec(
            num_scalar_prefetch=0,
            grid=grid,
            in_specs=[
                pl.BlockSpec((mblk, Kin), lambda i: (i, 0)),          # im2col rows
                pl.BlockSpec((Kin, Cp), lambda i: (0, 0)),            # w1 (constant)
                pl.BlockSpec((1, Cp), lambda i: (0, 0)),              # s1 (constant)
                pl.BlockSpec((3, 3 * Cp, Cp), lambda i: (0, 0, 0)),   # w2 (constant)
                pl.BlockSpec((1, Cp), lambda i: (0, 0)),              # s2 (constant)
                pl.BlockSpec((m_img, 2), lambda i: (0, 0)),           # edge masks
            ],
            out_specs=pl.BlockSpec((mblk, Cout), lambda i: (i, 0)),
            scratch_shapes=[
                pltpu.VMEM((bblk, (Ho + 2) * Wo, 3 * Cp), jnp.bfloat16)],
        ),
        compiler_params=pltpu.CompilerParams(
            dimension_semantics=("parallel",),
            vmem_limit_bytes=vmem_limit),
        cost_estimate=pl.CostEstimate(flops=flops, transcendentals=0,
                                      bytes_accessed=bytes_accessed),
    )(x_col, w1, s1, w2, s2, edge_mask)

    # (N*Ho*Wo, Cout) -> NCHW to match the PyTorch module's output layout.
    return jnp.transpose(out.reshape(N, Ho, Wo, Cout), (0, 3, 1, 2))


# ---------------------------------------------------------------------------
# Pure-JAX f32 reference (for correctness check)
# ---------------------------------------------------------------------------
def reference_forward(x_nchw, params):
    def conv(x, w, stride):
        return jax.lax.conv_general_dilated(
            x, w, (stride, stride), ((1, 1), (1, 1)),
            dimension_numbers=("NCHW", "OIHW", "NCHW"))

    def bn_relu(x, g, b, m, v):
        s = g / jnp.sqrt(v + _BN_EPS)
        sh = b - m * s
        return jnp.maximum(x * s[None, :, None, None] + sh[None, :, None, None], 0.0)

    y = bn_relu(conv(x_nchw, params["w1"], 2),
                params["gamma1"], params["beta1"], params["mean1"], params["var1"])
    y = bn_relu(conv(y, params["w2"], 1),
                params["gamma2"], params["beta2"], params["mean2"], params["var2"])
    return y


# ---------------------------------------------------------------------------
# Deterministic parameter init + smoke test
# ---------------------------------------------------------------------------
def init_params(key, in_channels, out_channels):
    ks = jax.random.split(key, 10)

    def nrm(k, shape, scale=0.1):
        return scale * jax.random.normal(k, shape, dtype=jnp.float32)

    return {
        "w1": nrm(ks[0], (out_channels, in_channels, 3, 3)),
        "gamma1": 1.0 + nrm(ks[1], (out_channels,)),
        "beta1": nrm(ks[2], (out_channels,)),
        "mean1": nrm(ks[3], (out_channels,)),
        "var1": 0.5 + jnp.abs(nrm(ks[4], (out_channels,), 0.5)),
        "w2": nrm(ks[5], (out_channels, out_channels, 3, 3)),
        "gamma2": 1.0 + nrm(ks[6], (out_channels,)),
        "beta2": nrm(ks[7], (out_channels,)),
        "mean2": nrm(ks[8], (out_channels,)),
        "var2": 0.5 + jnp.abs(nrm(ks[9], (out_channels,), 0.5)),
    }


if __name__ == "__main__":
    key = jax.random.PRNGKey(0)
    k_x, k_p = jax.random.split(key)

    N, Cin, Cout, H, W = 2, 4, 8, 16, 16
    x = jax.random.normal(k_x, (N, Cin, H, W), dtype=jnp.float32)
    params = init_params(k_p, Cin, Cout)

    out = jax.block_until_ready(strided_down_forward(x, params))
    ref = jax.block_until_ready(reference_forward(x, params))

    assert out.shape == (N, Cout, H // 2, W // 2), out.shape
    # bf16 matmul operands / bf16 y1 round trip (f32 MXU accumulation) -> relaxed
    # tolerance vs the f32 reference.
    np.testing.assert_allclose(np.asarray(out), np.asarray(ref), rtol=5e-2, atol=5e-2)
    print("KERNEL_OK")
</pallas_src>

<mosaic_0001>
module attributes {stable_mosaic.version = 11 : i64} {
  func.func @_strided_down_kernel(%arg0: i32, %arg1: memref<128x36xbf16, #tpu.memory_space<vmem>>, %arg2: memref<36x128xbf16, #tpu.memory_space<vmem>>, %arg3: memref<1x128xf32, #tpu.memory_space<vmem>>, %arg4: memref<3x384x128xbf16, #tpu.memory_space<vmem>>, %arg5: memref<1x128xf32, #tpu.memory_space<vmem>>, %arg6: memref<64x2xbf16, #tpu.memory_space<vmem>>, %arg7: memref<128x8xf32, #tpu.memory_space<vmem>>, %arg8: memref<2x80x384xbf16, #tpu.memory_space<vmem>>) attributes {dimension_semantics = [#tpu.dimension_semantics<parallel>], iteration_bounds = array<i64: 1>, scalar_prefetch = 0 : i64, scratch_operands = 1 : i64, tpu.core_type = #tpu.core_type<tc>, window_params = [{transform_indices = @transform_0, window_bounds = array<i64: 128, 36>}, {pipeline_mode = #tpu.pipeline_mode<synchronous>, transform_indices = @transform_1, window_bounds = array<i64: 36, 128>}, {pipeline_mode = #tpu.pipeline_mode<synchronous>, transform_indices = @transform_2, window_bounds = array<i64: 1, 128>}, {pipeline_mode = #tpu.pipeline_mode<synchronous>, transform_indices = @transform_3, window_bounds = array<i64: 3, 384, 128>}, {pipeline_mode = #tpu.pipeline_mode<synchronous>, transform_indices = @transform_4, window_bounds = array<i64: 1, 128>}, {pipeline_mode = #tpu.pipeline_mode<synchronous>, transform_indices = @transform_5, window_bounds = array<i64: 64, 2>}, {transform_indices = @transform_6, window_bounds = array<i64: 128, 8>}]} {
    %c0 = arith.constant 0 : index
    %c0_0 = arith.constant 0 : index
    %0 = vector.load %arg2[%c0, %c0_0] : memref<36x128xbf16, #tpu.memory_space<vmem>>, vector<36x128xbf16>
    %c0_1 = arith.constant 0 : index
    %c0_2 = arith.constant 0 : index
    %1 = vector.load %arg3[%c0_1, %c0_2] : memref<1x128xf32, #tpu.memory_space<vmem>>, vector<1x128xf32>
    %c0_3 = arith.constant 0 : index
    %c0_4 = arith.constant 0 : index
    %2 = vector.load %arg5[%c0_3, %c0_4] : memref<1x128xf32, #tpu.memory_space<vmem>>, vector<1x128xf32>
    %c0_5 = arith.constant 0 : index
    %c0_6 = arith.constant 0 : index
    %3 = vector.load %arg6[%c0_5, %c0_6] : memref<64x2xbf16, #tpu.memory_space<vmem>>, vector<64x1xbf16>
    %c0_7 = arith.constant 0 : index
    %c1 = arith.constant 1 : index
    %4 = vector.load %arg6[%c0_7, %c1] : memref<64x2xbf16, #tpu.memory_space<vmem>>, vector<64x1xbf16>
    %c0_8 = arith.constant 0 : index
    %c0_9 = arith.constant 0 : index
    %5 = vector.load %arg1[%c0_8, %c0_9] : memref<128x36xbf16, #tpu.memory_space<vmem>>, vector<64x36xbf16>
    %cst = arith.constant dense<0.000000e+00> : vector<64x128xf32>
    %6 = tpu.matmul %5, %0, %cst {dimension_numbers = #tpu.dot_dimension_numbers<[1], [0], [0], [1], [0, 0, 1, 1], [], []>} : vector<64x36xbf16>, vector<36x128xbf16>, vector<64x128xf32> -> vector<64x128xf32>
    %7 = vector.broadcast %1 : vector<1x128xf32> to vector<64x128xf32>
    %8 = arith.addf %6, %7 : vector<64x128xf32>
    %cst_10 = arith.constant 0.000000e+00 : f32
    %9 = vector.broadcast %cst_10 : f32 to vector<64x128xf32>
    %10 = arith.maximumf %8, %9 : vector<64x128xf32>
    %11 = arith.truncf %10 : vector<64x128xf32> to vector<64x128xbf16>
    %12 = vector.broadcast %3 : vector<64x1xbf16> to vector<64x128xbf16>
    %13 = arith.mulf %11, %12 : vector<64x128xbf16>
    %14 = vector.broadcast %4 : vector<64x1xbf16> to vector<64x128xbf16>
    %15 = arith.mulf %11, %14 : vector<64x128xbf16>
    %c0_11 = arith.constant 0 : index
    %c9 = arith.constant 9 : index
    %c0_12 = arith.constant 0 : index
    %16 = vector.load %arg8[%c0_11, %c9, %c0_12] : memref<2x80x384xbf16, #tpu.memory_space<vmem>>, vector<1x64x128xbf16>
    %17 = vector.shape_cast %16 : vector<1x64x128xbf16> to vector<64x128xbf16>
    %18 = vector.shape_cast %13 : vector<64x128xbf16> to vector<1x64x128xbf16>
    tpu.vector_store %arg8[%c0_11, %c9, %c0_12], %18 {strides = array<i32>} : memref<2x80x384xbf16, #tpu.memory_space<vmem>>, vector<1x64x128xbf16>,
    %c0_13 = arith.constant 0 : index
    %c8 = arith.constant 8 : index
    %c128 = arith.constant 128 : index
    %19 = vector.load %arg8[%c0_13, %c8, %c128] : memref<2x80x384xbf16, #tpu.memory_space<vmem>>, vector<1x64x128xbf16>
    %20 = vector.shape_cast %19 : vector<1x64x128xbf16> to vector<64x128xbf16>
    %21 = vector.shape_cast %11 : vector<64x128xbf16> to vector<1x64x128xbf16>
    tpu.vector_store %arg8[%c0_13, %c8, %c128], %21 {strides = array<i32>} : memref<2x80x384xbf16, #tpu.memory_space<vmem>>, vector<1x64x128xbf16>,
    %c0_14 = arith.constant 0 : index
    %c7 = arith.constant 7 : index
    %c256 = arith.constant 256 : index
    %22 = vector.load %arg8[%c0_14, %c7, %c256] : memref<2x80x384xbf16, #tpu.memory_space<vmem>>, vector<1x64x128xbf16>
    %23 = vector.shape_cast %22 : vector<1x64x128xbf16> to vector<64x128xbf16>
    %24 = vector.shape_cast %15 : vector<64x128xbf16> to vector<1x64x128xbf16>
    tpu.vector_store %arg8[%c0_14, %c7, %c256], %24 {strides = array<i32>} : memref<2x80x384xbf16, #tpu.memory_space<vmem>>, vector<1x64x128xbf16>,
    %cst_15 = arith.constant 0.000000e+00 : bf16
    %25 = vector.broadcast %cst_15 : bf16 to vector<1x128xbf16>
    %c0_16 = arith.constant 0 : index
    %c8_17 = arith.constant 8 : index
    %c0_18 = arith.constant 0 : index
    %26 = vector.load %arg8[%c0_16, %c8_17, %c0_18] : memref<2x80x384xbf16, #tpu.memory_space<vmem>>, vector<1x1x128xbf16>
    %27 = vector.shape_cast %26 : vector<1x1x128xbf16> to vector<1x128xbf16>
    %28 = vector.shape_cast %25 : vector<1x128xbf16> to vector<1x1x128xbf16>
    tpu.vector_store %arg8[%c0_16, %c8_17, %c0_18], %28 {strides = array<i32>} : memref<2x80x384xbf16, #tpu.memory_space<vmem>>, vector<1x1x128xbf16>,
    %cst_19 = arith.constant 0.000000e+00 : bf16
    %29 = vector.broadcast %cst_19 : bf16 to vector<1x128xbf16>
    %c0_20 = arith.constant 0 : index
    %c71 = arith.constant 71 : index
    %c256_21 = arith.constant 256 : index
    %30 = vector.load %arg8[%c0_20, %c71, %c256_21] : memref<2x80x384xbf16, #tpu.memory_space<vmem>>, vector<1x1x128xbf16>
    %31 = vector.shape_cast %30 : vector<1x1x128xbf16> to vector<1x128xbf16>
    %32 = vector.shape_cast %29 : vector<1x128xbf16> to vector<1x1x128xbf16>
    tpu.vector_store %arg8[%c0_20, %c71, %c256_21], %32 {strides = array<i32>} : memref<2x80x384xbf16, #tpu.memory_space<vmem>>, vector<1x1x128xbf16>,
    %cst_22 = arith.constant 0.000000e+00 : bf16
    %33 = vector.broadcast %cst_22 : bf16 to vector<8x384xbf16>
    %c0_23 = arith.constant 0 : index
    %c0_24 = arith.constant 0 : index
    %c0_25 = arith.constant 0 : index
    %34 = vector.load %arg8[%c0_23, %c0_24, %c0_25] : memref<2x80x384xbf16, #tpu.memory_space<vmem>>, vector<1x8x384xbf16>
    %35 = vector.shape_cast %34 : vector<1x8x384xbf16> to vector<8x384xbf16>
    %36 = vector.shape_cast %33 : vector<8x384xbf16> to vector<1x8x384xbf16>
    tpu.vector_store %arg8[%c0_23, %c0_24, %c0_25], %36 {strides = array<i32>} : memref<2x80x384xbf16, #tpu.memory_space<vmem>>, vector<1x8x384xbf16>,
    %cst_26 = arith.constant 0.000000e+00 : bf16
    %37 = vector.broadcast %cst_26 : bf16 to vector<8x384xbf16>
    %c0_27 = arith.constant 0 : index
    %c72 = arith.constant 72 : index
    %c0_28 = arith.constant 0 : index
    %38 = vector.load %arg8[%c0_27, %c72, %c0_28] : memref<2x80x384xbf16, #tpu.memory_space<vmem>>, vector<1x8x384xbf16>
    %39 = vector.shape_cast %38 : vector<1x8x384xbf16> to vector<8x384xbf16>
    %40 = vector.shape_cast %37 : vector<8x384xbf16> to vector<1x8x384xbf16>
    tpu.vector_store %arg8[%c0_27, %c72, %c0_28], %40 {strides = array<i32>} : memref<2x80x384xbf16, #tpu.memory_space<vmem>>, vector<1x8x384xbf16>,
    %cst_29 = arith.constant 0.000000e+00 : f32
    %41 = vector.broadcast %cst_29 : f32 to vector<64x128xf32>
    %c0_30 = arith.constant 0 : index
    %c0_31 = arith.constant 0 : index
    %c0_32 = arith.constant 0 : index
    %42 = vector.load %arg8[%c0_30, %c0_31, %c0_32] : memref<2x80x384xbf16, #tpu.memory_space<vmem>>, vector<1x64x384xbf16>
    %43 = vector.shape_cast %42 : vector<1x64x384xbf16> to vector<64x384xbf16>
    %c0_33 = arith.constant 0 : index
    %c0_34 = arith.constant 0 : index
    %c0_35 = arith.constant 0 : index
    %44 = vector.load %arg4[%c0_33, %c0_34, %c0_35] : memref<3x384x128xbf16, #tpu.memory_space<vmem>>, vector<1x384x128xbf16>
    %45 = vector.shape_cast %44 : vector<1x384x128xbf16> to vector<384x128xbf16>
    %cst_36 = arith.constant dense<0.000000e+00> : vector<64x128xf32>
    %46 = tpu.matmul %43, %45, %cst_36 {dimension_numbers = #tpu.dot_dimension_numbers<[1], [0], [0], [1], [0, 0, 1, 1], [], []>} : vector<64x384xbf16>, vector<384x128xbf16>, vector<64x128xf32> -> vector<64x128xf32>
    %47 = arith.addf %41, %46 : vector<64x128xf32>
    %c0_37 = arith.constant 0 : index
    %c8_38 = arith.constant 8 : index
    %c0_39 = arith.constant 0 : index
    %48 = vector.load %arg8[%c0_37, %c8_38, %c0_39] : memref<2x80x384xbf16, #tpu.memory_space<vmem>>, vector<1x64x384xbf16>
    %49 = vector.shape_cast %48 : vector<1x64x384xbf16> to vector<64x384xbf16>
    %c1_40 = arith.constant 1 : index
    %c0_41 = arith.constant 0 : index
    %c0_42 = arith.constant 0 : index
    %50 = vector.load %arg4[%c1_40, %c0_41, %c0_42] : memref<3x384x128xbf16, #tpu.memory_space<vmem>>, vector<1x384x128xbf16>
    %51 = vector.shape_cast %50 : vector<1x384x128xbf16> to vector<384x128xbf16>
    %cst_43 = arith.constant dense<0.000000e+00> : vector<64x128xf32>
    %52 = tpu.matmul %49, %51, %cst_43 {dimension_numbers = #tpu.dot_dimension_numbers<[1], [0], [0], [1], [0, 0, 1, 1], [], []>} : vector<64x384xbf16>, vector<384x128xbf16>, vector<64x128xf32> -> vector<64x128xf32>
    %53 = arith.addf %47, %52 : vector<64x128xf32>
    %c0_44 = arith.constant 0 : index
    %c16 = arith.constant 16 : index
    %c0_45 = arith.constant 0 : index
    %54 = vector.load %arg8[%c0_44, %c16, %c0_45] : memref<2x80x384xbf16, #tpu.memory_space<vmem>>, vector<1x64x384xbf16>
    %55 = vector.shape_cast %54 : vector<1x64x384xbf16> to vector<64x384xbf16>
    %c2 = arith.constant 2 : index
    %c0_46 = arith.constant 0 : index
    %c0_47 = arith.constant 0 : index
    %56 = vector.load %arg4[%c2, %c0_46, %c0_47] : memref<3x384x128xbf16, #tpu.memory_space<vmem>>, vector<1x384x128xbf16>
    %57 = vector.shape_cast %56 : vector<1x384x128xbf16> to vector<384x128xbf16>
    %cst_48 = arith.constant dense<0.000000e+00> : vector<64x128xf32>
    %58 = tpu.matmul %55, %57, %cst_48 {dimension_numbers = #tpu.dot_dimension_numbers<[1], [0], [0], [1], [0, 0, 1, 1], [], []>} : vector<64x384xbf16>, vector<384x128xbf16>, vector<64x128xf32> -> vector<64x128xf32>
    %59 = arith.addf %53, %58 : vector<64x128xf32>
    %60 = vector.broadcast %2 : vector<1x128xf32> to vector<64x128xf32>
    %61 = arith.addf %59, %60 : vector<64x128xf32>
    %cst_49 = arith.constant 0.000000e+00 : f32
    %62 = vector.broadcast %cst_49 : f32 to vector<64x128xf32>
    %63 = arith.maximumf %61, %62 : vector<64x128xf32>
    %64 = vector.extract_strided_slice %63 {offsets = [0, 0], sizes = [64, 8], strides = [1, 1]} : vector<64x128xf32> to vector<64x8xf32>
    %c0_50 = arith.constant 0 : index
    %c0_51 = arith.constant 0 : index
    %65 = vector.load %arg7[%c0_50, %c0_51] : memref<128x8xf32, #tpu.memory_space<vmem>>, vector<64x8xf32>
    tpu.vector_store %arg7[%c0_50, %c0_51], %64 {strides = array<i32>} : memref<128x8xf32, #tpu.memory_space<vmem>>, vector<64x8xf32>,
    %c64 = arith.constant 64 : index
    %c0_52 = arith.constant 0 : index
    %66 = vector.load %arg1[%c64, %c0_52] : memref<128x36xbf16, #tpu.memory_space<vmem>>, vector<64x36xbf16>
    %cst_53 = arith.constant dense<0.000000e+00> : vector<64x128xf32>
    %67 = tpu.matmul %66, %0, %cst_53 {dimension_numbers = #tpu.dot_dimension_numbers<[1], [0], [0], [1], [0, 0, 1, 1], [], []>} : vector<64x36xbf16>, vector<36x128xbf16>, vector<64x128xf32> -> vector<64x128xf32>
    %68 = vector.broadcast %1 : vector<1x128xf32> to vector<64x128xf32>
    %69 = arith.addf %67, %68 : vector<64x128xf32>
    %cst_54 = arith.constant 0.000000e+00 : f32
    %70 = vector.broadcast %cst_54 : f32 to vector<64x128xf32>
    %71 = arith.maximumf %69, %70 : vector<64x128xf32>
    %72 = arith.truncf %71 : vector<64x128xf32> to vector<64x128xbf16>
    %73 = vector.broadcast %3 : vector<64x1xbf16> to vector<64x128xbf16>
    %74 = arith.mulf %72, %73 : vector<64x128xbf16>
    %75 = vector.broadcast %4 : vector<64x1xbf16> to vector<64x128xbf16>
    %76 = arith.mulf %72, %75 : vector<64x128xbf16>
    %c1_55 = arith.constant 1 : index
    %c9_56 = arith.constant 9 : index
    %c0_57 = arith.constant 0 : index
    %77 = vector.load %arg8[%c1_55, %c9_56, %c0_57] : memref<2x80x384xbf16, #tpu.memory_space<vmem>>, vector<1x64x128xbf16>
    %78 = vector.shape_cast %77 : vector<1x64x128xbf16> to vector<64x128xbf16>
    %79 = vector.shape_cast %74 : vector<64x128xbf16> to vector<1x64x128xbf16>
    tpu.vector_store %arg8[%c1_55, %c9_56, %c0_57], %79 {strides = array<i32>} : memref<2x80x384xbf16, #tpu.memory_space<vmem>>, vector<1x64x128xbf16>,
    %c1_58 = arith.constant 1 : index
    %c8_59 = arith.constant 8 : index
    %c128_60 = arith.constant 128 : index
    %80 = vector.load %arg8[%c1_58, %c8_59, %c128_60] : memref<2x80x384xbf16, #tpu.memory_space<vmem>>, vector<1x64x128xbf16>
    %81 = vector.shape_cast %80 : vector<1x64x128xbf16> to vector<64x128xbf16>
    %82 = vector.shape_cast %72 : vector<64x128xbf16> to vector<1x64x128xbf16>
    tpu.vector_store %arg8[%c1_58, %c8_59, %c128_60], %82 {strides = array<i32>} : memref<2x80x384xbf16, #tpu.memory_space<vmem>>, vector<1x64x128xbf16>,
    %c1_61 = arith.constant 1 : index
    %c7_62 = arith.constant 7 : index
    %c256_63 = arith.constant 256 : index
    %83 = vector.load %arg8[%c1_61, %c7_62, %c256_63] : memref<2x80x384xbf16, #tpu.memory_space<vmem>>, vector<1x64x128xbf16>
    %84 = vector.shape_cast %83 : vector<1x64x128xbf16> to vector<64x128xbf16>
    %85 = vector.shape_cast %76 : vector<64x128xbf16> to vector<1x64x128xbf16>
    tpu.vector_store %arg8[%c1_61, %c7_62, %c256_63], %85 {strides = array<i32>} : memref<2x80x384xbf16, #tpu.memory_space<vmem>>, vector<1x64x128xbf16>,
    %cst_64 = arith.constant 0.000000e+00 : bf16
    %86 = vector.broadcast %cst_64 : bf16 to vector<1x128xbf16>
    %c1_65 = arith.constant 1 : index
    %c8_66 = arith.constant 8 : index
    %c0_67 = arith.constant 0 : index
    %87 = vector.load %arg8[%c1_65, %c8_66, %c0_67] : memref<2x80x384xbf16, #tpu.memory_space<vmem>>, vector<1x1x128xbf16>
    %88 = vector.shape_cast %87 : vector<1x1x128xbf16> to vector<1x128xbf16>
    %89 = vector.shape_cast %86 : vector<1x128xbf16> to vector<1x1x128xbf16>
    tpu.vector_store %arg8[%c1_65, %c8_66, %c0_67], %89 {strides = array<i32>} : memref<2x80x384xbf16, #tpu.memory_space<vmem>>, vector<1x1x128xbf16>,
    %cst_68 = arith.constant 0.000000e+00 : bf16
    %90 = vector.broadcast %cst_68 : bf16 to vector<1x128xbf16>
    %c1_69 = arith.constant 1 : index
    %c71_70 = arith.constant 71 : index
    %c256_71 = arith.constant 256 : index
    %91 = vector.load %arg8[%c1_69, %c71_70, %c256_71] : memref<2x80x384xbf16, #tpu.memory_space<vmem>>, vector<1x1x128xbf16>
    %92 = vector.shape_cast %91 : vector<1x1x128xbf16> to vector<1x128xbf16>
    %93 = vector.shape_cast %90 : vector<1x128xbf16> to vector<1x1x128xbf16>
    tpu.vector_store %arg8[%c1_69, %c71_70, %c256_71], %93 {strides = array<i32>} : memref<2x80x384xbf16, #tpu.memory_space<vmem>>, vector<1x1x128xbf16>,
    %cst_72 = arith.constant 0.000000e+00 : bf16
    %94 = vector.broadcast %cst_72 : bf16 to vector<8x384xbf16>
    %c1_73 = arith.constant 1 : index
    %c0_74 = arith.constant 0 : index
    %c0_75 = arith.constant 0 : index
    %95 = vector.load %arg8[%c1_73, %c0_74, %c0_75] : memref<2x80x384xbf16, #tpu.memory_space<vmem>>, vector<1x8x384xbf16>
    %96 = vector.shape_cast %95 : vector<1x8x384xbf16> to vector<8x384xbf16>
    %97 = vector.shape_cast %94 : vector<8x384xbf16> to vector<1x8x384xbf16>
    tpu.vector_store %arg8[%c1_73, %c0_74, %c0_75], %97 {strides = array<i32>} : memref<2x80x384xbf16, #tpu.memory_space<vmem>>, vector<1x8x384xbf16>,
    %cst_76 = arith.constant 0.000000e+00 : bf16
    %98 = vector.broadcast %cst_76 : bf16 to vector<8x384xbf16>
    %c1_77 = arith.constant 1 : index
    %c72_78 = arith.constant 72 : index
    %c0_79 = arith.constant 0 : index
    %99 = vector.load %arg8[%c1_77, %c72_78, %c0_79] : memref<2x80x384xbf16, #tpu.memory_space<vmem>>, vector<1x8x384xbf16>
    %100 = vector.shape_cast %99 : vector<1x8x384xbf16> to vector<8x384xbf16>
    %101 = vector.shape_cast %98 : vector<8x384xbf16> to vector<1x8x384xbf16>
    tpu.vector_store %arg8[%c1_77, %c72_78, %c0_79], %101 {strides = array<i32>} : memref<2x80x384xbf16, #tpu.memory_space<vmem>>, vector<1x8x384xbf16>,
    %cst_80 = arith.constant 0.000000e+00 : f32
    %102 = vector.broadcast %cst_80 : f32 to vector<64x128xf32>
    %c1_81 = arith.constant 1 : index
    %c0_82 = arith.constant 0 : index
    %c0_83 = arith.constant 0 : index
    %103 = vector.load %arg8[%c1_81, %c0_82, %c0_83] : memref<2x80x384xbf16, #tpu.memory_space<vmem>>, vector<1x64x384xbf16>
    %104 = vector.shape_cast %103 : vector<1x64x384xbf16> to vector<64x384xbf16>
    %c0_84 = arith.constant 0 : index
    %c0_85 = arith.constant 0 : index
    %c0_86 = arith.constant 0 : index
    %105 = vector.load %arg4[%c0_84, %c0_85, %c0_86] : memref<3x384x128xbf16, #tpu.memory_space<vmem>>, vector<1x384x128xbf16>
    %106 = vector.shape_cast %105 : vector<1x384x128xbf16> to vector<384x128xbf16>
    %cst_87 = arith.constant dense<0.000000e+00> : vector<64x128xf32>
    %107 = tpu.matmul %104, %106, %cst_87 {dimension_numbers = #tpu.dot_dimension_numbers<[1], [0], [0], [1], [0, 0, 1, 1], [], []>} : vector<64x384xbf16>, vector<384x128xbf16>, vector<64x128xf32> -> vector<64x128xf32>
    %108 = arith.addf %102, %107 : vector<64x128xf32>
    %c1_88 = arith.constant 1 : index
    %c8_89 = arith.constant 8 : index
    %c0_90 = arith.constant 0 : index
    %109 = vector.load %arg8[%c1_88, %c8_89, %c0_90] : memref<2x80x384xbf16, #tpu.memory_space<vmem>>, vector<1x64x384xbf16>
    %110 = vector.shape_cast %109 : vector<1x64x384xbf16> to vector<64x384xbf16>
    %c1_91 = arith.constant 1 : index
    %c0_92 = arith.constant 0 : index
    %c0_93 = arith.constant 0 : index
    %111 = vector.load %arg4[%c1_91, %c0_92, %c0_93] : memref<3x384x128xbf16, #tpu.memory_space<vmem>>, vector<1x384x128xbf16>
    %112 = vector.shape_cast %111 : vector<1x384x128xbf16> to vector<384x128xbf16>
    %cst_94 = arith.constant dense<0.000000e+00> : vector<64x128xf32>
    %113 = tpu.matmul %110, %112, %cst_94 {dimension_numbers = #tpu.dot_dimension_numbers<[1], [0], [0], [1], [0, 0, 1, 1], [], []>} : vector<64x384xbf16>, vector<384x128xbf16>, vector<64x128xf32> -> vector<64x128xf32>
    %114 = arith.addf %108, %113 : vector<64x128xf32>
    %c1_95 = arith.constant 1 : index
    %c16_96 = arith.constant 16 : index
    %c0_97 = arith.constant 0 : index
    %115 = vector.load %arg8[%c1_95, %c16_96, %c0_97] : memref<2x80x384xbf16, #tpu.memory_space<vmem>>, vector<1x64x384xbf16>
    %116 = vector.shape_cast %115 : vector<1x64x384xbf16> to vector<64x384xbf16>
    %c2_98 = arith.constant 2 : index
    %c0_99 = arith.constant 0 : index
    %c0_100 = arith.constant 0 : index
    %117 = vector.load %arg4[%c2_98, %c0_99, %c0_100] : memref<3x384x128xbf16, #tpu.memory_space<vmem>>, vector<1x384x128xbf16>
    %118 = vector.shape_cast %117 : vector<1x384x128xbf16> to vector<384x128xbf16>
    %cst_101 = arith.constant dense<0.000000e+00> : vector<64x128xf32>
    %119 = tpu.matmul %116, %118, %cst_101 {dimension_numbers = #tpu.dot_dimension_numbers<[1], [0], [0], [1], [0, 0, 1, 1], [], []>} : vector<64x384xbf16>, vector<384x128xbf16>, vector<64x128xf32> -> vector<64x128xf32>
    %120 = arith.addf %114, %119 : vector<64x128xf32>
    %121 = vector.broadcast %2 : vector<1x128xf32> to vector<64x128xf32>
    %122 = arith.addf %120, %121 : vector<64x128xf32>
    %cst_102 = arith.constant 0.000000e+00 : f32
    %123 = vector.broadcast %cst_102 : f32 to vector<64x128xf32>
    %124 = arith.maximumf %122, %123 : vector<64x128xf32>
    %125 = vector.extract_strided_slice %124 {offsets = [0, 0], sizes = [64, 8], strides = [1, 1]} : vector<64x128xf32> to vector<64x8xf32>
    %c64_103 = arith.constant 64 : index
    %c0_104 = arith.constant 0 : index
    %126 = vector.load %arg7[%c64_103, %c0_104] : memref<128x8xf32, #tpu.memory_space<vmem>>, vector<64x8xf32>
    tpu.vector_store %arg7[%c64_103, %c0_104], %125 {strides = array<i32>} : memref<128x8xf32, #tpu.memory_space<vmem>>, vector<64x8xf32>,
    return
  }
  func.func @transform_0(%arg0: i32) -> (i32, i32) {
    %c0_i32 = arith.constant 0 : i32
    %c0_i32_0 = arith.constant 0 : i32
    return %arg0, %c0_i32 : i32, i32
  }
  func.func @transform_1(%arg0: i32) -> (i32, i32) {
    %c0_i32 = arith.constant 0 : i32
    %c0_i32_0 = arith.constant 0 : i32
    %c0_i32_1 = arith.constant 0 : i32
    return %c0_i32, %c0_i32_0 : i32, i32
  }
  func.func @transform_2(%arg0: i32) -> (i32, i32) {
    %c0_i32 = arith.constant 0 : i32
    %c0_i32_0 = arith.constant 0 : i32
    %c0_i32_1 = arith.constant 0 : i32
    return %c0_i32, %c0_i32_0 : i32, i32
  }
  func.func @transform_3(%arg0: i32) -> (i32, i32, i32) {
    %c0_i32 = arith.constant 0 : i32
    %c0_i32_0 = arith.constant 0 : i32
    %c0_i32_1 = arith.constant 0 : i32
    %c0_i32_2 = arith.constant 0 : i32
    return %c0_i32, %c0_i32_0, %c0_i32_1 : i32, i32, i32
  }
  func.func @transform_4(%arg0: i32) -> (i32, i32) {
    %c0_i32 = arith.constant 0 : i32
    %c0_i32_0 = arith.constant 0 : i32
    %c0_i32_1 = arith.constant 0 : i32
    return %c0_i32, %c0_i32_0 : i32, i32
  }
  func.func @transform_5(%arg0: i32) -> (i32, i32) {
    %c0_i32 = arith.constant 0 : i32
    %c0_i32_0 = arith.constant 0 : i32
    %c0_i32_1 = arith.constant 0 : i32
    return %c0_i32, %c0_i32_0 : i32, i32
  }
  func.func @transform_6(%arg0: i32) -> (i32, i32) {
    %c0_i32 = arith.constant 0 : i32
    %c0_i32_0 = arith.constant 0 : i32
    return %arg0, %c0_i32 : i32, i32
  }
}

</mosaic_0001>

<bundles_post_ra>
// kernel: strided_down_forward.1
= control target key start
LH: loop header
LB: loop body
LE: loop exit
PB: predicated region body
PF: predicated region fallthrough
CT: control target
= control target key end

     0   :  { %v4114_v1 = vmov 1   ;;  %v4115_v2 = vmov 0   ;;  %vm88_vm0 = vcmask 293888   ;;  %vm101_vm1 = vcmask 1041408   ;;  %s5148_s1 = inlined_call_operand.vmem [shape: bf16[36,128], index: 1, kind: input, shape index: {}]   ;;  %s5149_s0 = inlined_call_operand.vmem [shape: bf16[128,36], index: 0, kind: input, shape index: {}]   ;;  %s5150_s5 = inlined_call_operand.vmem [shape: bf16[64,2], index: 5, kind: input, shape index: {}]   ;;  %s5151_s3 = inlined_call_operand.vmem [shape: bf16[3,384,128], index: 3, kind: input, shape index: {}]   ;;  %s5152_s2 = inlined_call_operand.vmem [shape: f32[1,128], index: 2, kind: input, shape index: {}]   ;;  %s5153_s4 = inlined_call_operand.vmem [shape: f32[1,128], index: 4, kind: input, shape index: {}]   ;;  %s5154_s6 = inlined_call_operand.vmem [shape: f32[128,8], index: 6, kind: output, shape index: {}]  }
   0x1   :  { %v3954_v0 = vld [vmem:[%s5148_s1] sm:$0xff]   ;;  %3950 = vset.pattern.permute.xlu1 %v4114_v1  ;;  %3949 = vset.pattern.permute.xlu0 %v4114_v1  ;;  %563 = vst [vmem:[#allocation2] sm:$0xf] %v4115_v2  ;;  %564 = vst [vmem:[#allocation2 + $0x8] sm:$0xf] %v4115_v2  ;;  %v3955_v3 = vld [vmem:[%s5148_s1 + $0x8] sm:$0xff]   ;;  %v190_v55 = vlaneseq }
   0x2   :  { %567 = vst [vmem:[#allocation2 + $0x68] sm:$0xf0] %v4115_v2  ;;  %568 = vst [vmem:[#allocation2 + $0x70] sm:$0xf0] %v4115_v2  ;;  %3676 = vmatprep.subr.bf16.mxu0 %v3954_v0  ;;  %v3957_v5 = vld [vmem:[%s5149_s0] sm:$0xff]   ;;  %v3958_v9 = vld [vmem:[%s5149_s0 + $0x8] sm:$0xff]  }
   0x3   :  { %1902 = vst [vmem:[#allocation2 + $0x78] sm:$0xf] %v4115_v2  ;;  %1903 = vst [vmem:[#allocation2 + $0x80] sm:$0xf] %v4115_v2  ;;  %3677 = vmatpush3.bf16.msra.mxu0 %v3954_v0  ;;  %3682 = vmatprep.mubr.msk.bf16.mxu0 %vm88_vm0, %v3957_v5  ;;  %v33_v6 = vld [vmem:[%s5150_s5 + $0x8] sm:$0xf] }
   0x4   :  { %1906 = vst [vmem:[#allocation2 + $0xe0] sm:$0xf0] %v4115_v2  ;;  %1907 = vst [vmem:[#allocation2 + $0xe8] sm:$0xf0] %v4115_v2  ;;  %3678 = vmatprep.subr.bf16.mxu0 %v3955_v3  ;;  %329 = vperm.xlu1 %3950, %v33_v6   ;;  %v31_v7 = vld [vmem:[%s5150_s5] sm:$0xf] }
   0x5   :  { %v3956_v4 = vld [vmem:[%s5148_s1 + $0x10] ss:$0 sps:$4 sm:$0x33]   ;;  %307 = vperm.xlu0 %3949, %v31_v7   ;;  %v34_v10 = vld [vmem:[%s5150_s5 + $0xc] sm:$0xf]  ;;  %v3960_v17 = vld [vmem:[%s5149_s0 + $0x18] sm:$0xff]  }
   0x6   :  { %v4181_v8 = vsel %vm101_vm1, %v3956_v4, 0  ;;  %v3959_v11 = vld [vmem:[%s5149_s0 + $0x10] sm:$0xff]   ;;  %v32_v12 = vld [vmem:[%s5150_s5 + $0x4] sm:$0xf]  ;;  %v38_v15 = vld [vmem:[%s5150_s5 + $0x1c] sm:$0xf] }
   0x7   :  { %3679 = vmatpush3.bf16.msra.mxu0 %v3955_v3  ;;  %v36_v13 = vld [vmem:[%s5150_s5 + $0x14] sm:$0xf]  ;;  %v35_v14 = vld [vmem:[%s5150_s5 + $0x10] sm:$0xf]  ;;  %v37_v16 = vld [vmem:[%s5150_s5 + $0x18] sm:$0xf] }
   0x8   :  { %3944 = vmatprep.subr.msk.bf16.mxu0 %vm101_vm1, %v3956_v4  ;;  %340 = vperm.xlu1 %3950, %v34_v10   ;;  %v3961_v18 = vld [vmem:[%s5151_s3 + $0x140] sm:$0xff]   ;;  %v3964_v19 = vld [vmem:[%s5151_s3 + $0x148] sm:$0xff]   ;;  %v3967_v22 = vld [vmem:[%s5151_s3 + $0x150] sm:$0xff]   ;;  %v4116_v53 = vmov 839922192   ;;  %v191_v57 = vshrl.u32 %v190_v55, 7 }
   0x9   :  { %318 = vperm.xlu0 %3949, %v32_v12   ;;  %v3962_v20 = vld [vmem:[%s5151_s3 + $0x100] sm:$0xff]   ;;  %v3965_v23 = vld [vmem:[%s5151_s3 + $0x108] sm:$0xff]   ;;  %v3970_v24 = vld [vmem:[%s5151_s3 + $0x158] sm:$0xff]   ;;  %v188_v54 = vunpack.c.l.s4 %v4116_v53  ;;  %vm481_vm2 = vcmask 1043456   ;;  %vm463_vm3 = vcmask 1047556   ;;  %vm540_vm5 = vcmask 1047555  }
   0xa   :  { %3357 = vmatprep.subr.bf16.mxu1 %v3962_v20  ;;  %v3963_v21 = vld [vmem:[%s5151_s3 + $0xc0] sm:$0xff]   ;;  %v3966_v25 = vld [vmem:[%s5151_s3 + $0xc8] sm:$0xff]   ;;  %v3968_v27 = vld [vmem:[%s5151_s3 + $0x110] sm:$0xff]   ;;  %vm464_vm4 = vsmask.f32 7954  ;;  %vm553_vm11 = vcmask 1044484  }
   0xb   :  { %3681 = vmatpush3.bf16.msra.mxu0 %v4181_v8  ;;  %3358 = vmatpush3.bf16.msra.mxu1 %v3963_v21  ;;  %v3973_v26 = vld [vmem:[%s5151_s3 + $0x160] sm:$0xff]   ;;  %v3969_v28 = vld [vmem:[%s5151_s3 + $0xd0] sm:$0xff]   ;;  %v3976_v29 = vld [vmem:[%s5151_s3 + $0x168] sm:$0xff]   ;;  %v189_v56 = vunpack.c.0.s8 %v188_v54  ;;  %vm541_vm6 = vsmask.f32 7950  ;;  %vm472_vm12 = vcmask 1044480  }
   0xc   :  { %362 = vperm.xlu1 %3950, %v36_v13   ;;  %3690 = vmatprep.subr.bf16.mxu0 %v3961_v18  ;;  %v3971_v30 = vld [vmem:[%s5151_s3 + $0x118] sm:$0xff]   ;;  %v3979_v32 = vld [vmem:[%s5151_s3 + $0x170] sm:$0xff]   ;;  %v3974_v33 = vld [vmem:[%s5151_s3 + $0x120] sm:$0xff]   ;;  %vm422_vm7 = vsmask.f32 4352 }
   0xd   :  { %351 = vperm.xlu0 %3949, %v35_v14   ;;  %3359 = vmatprep.subr.bf16.mxu1 %v3965_v23  ;;  %v3972_v31 = vld [vmem:[%s5151_s3 + $0xd8] sm:$0xff]   ;;  %v3975_v34 = vld [vmem:[%s5151_s3 + $0xe0] sm:$0xff]   ;;  %v3977_v36 = vld [vmem:[%s5151_s3 + $0x128] sm:$0xff]   ;;  %v4305_v60 = vsub.s32 %v189_v56, %v191_v57  ;;  %vm499_vm8 = vsmask.f32 3328 }
   0xe   :  { %3683 = vmatmul.mubr.msk.bf16.vlgmr.msra.gmra.mrb[0].mxu0 %vm88_vm0, %v3958_v9  ;;  %v3982_v35 = vld [vmem:[%s5151_s3 + $0x178] sm:$0xff]   ;;  %v3978_v37 = vld [vmem:[%s5151_s3 + $0xe8] sm:$0xff]   ;;  %v4279_v38 = vld [vmem:[%s5151_s3 + $0x80] sm:$0xff]  }
   0xf   :  { %3686 = vmatprep.mubr.msk.bf16.mxu0 %vm88_vm0, %v3959_v11  ;;  %3691 = vmatpush3.bf16.msra.mxu0 %v3961_v18  ;;  %v3980_v39 = vld [vmem:[%s5151_s3 + $0x130] sm:$0xff]   ;;  %v3983_v41 = vld [vmem:[%s5151_s3 + $0x138] sm:$0xff]   ;;  %v3986_v43 = vld [vmem:[%s5151_s3 + $0x40] sm:$0xff]  }
  0x10   :  { %384 = vperm.xlu1 %3950, %v38_v15   ;;  %3692 = vmatprep.subr.bf16.mxu0 %v3964_v19  ;;  %v3981_v40 = vld [vmem:[%s5151_s3 + $0xf0] sm:$0xff]   ;;  %v3984_v42 = vld [vmem:[%s5151_s3 + $0xf8] sm:$0xff]   ;;  %v4310_v61 = vld [vmem:[%s5152_s2] ss:$0 sm:$0xff] }
  0x11   :  { %373 = vperm.xlu0 %3949, %v37_v16   ;;  %3360 = vmatpush3.bf16.msra.mxu1 %v3966_v25  ;;  %vm4369_vm9 = vmand %vm463_vm3, %vm464_vm4  ;;  %vm558_vm3 = vcmask 1043459  }
  0x12   :  { %3361 = vmatprep.subr.bf16.mxu1 %v3968_v27  ;;  %vm4376_vm10 = vmand %vm540_vm5, %vm541_vm6 }
  0x13   :  { %3693 = vmatpush3.bf16.msra.mxu0 %v3964_v19  ;;  %vm4424_vm13 = vmand %vm553_vm11, %vm422_vm7 }
  0x14   :  { %3952 = vset.pattern.permute.xlu1 %v4115_v2  ;;  %3694 = vmatprep.subr.bf16.mxu0 %v3967_v22  ;;  %vm4440_vm14 = vmand %vm481_vm2, %vm499_vm8 }
  0x15   :  { %3951 = vset.pattern.permute.xlu0 %v4115_v2  ;;  %196 = vperm.xlu1 %3952, %v32_v12   ;;  %vm4460_vm15 = vmand %vm472_vm12, %vm422_vm7 }
  0x16   :  { %3687 = vmatmul.mubr.msk.bf16.gmra.mrb[4].mxu0 %vm88_vm0, %v3960_v17  ;;  %184 = vperm.xlu0 %3951, %v31_v7   ;;  %vm4478_vm4 = vmand %vm558_vm3, %vm541_vm6 }
  0x17   :  { %3695 = vmatpush3.bf16.msra.mxu0 %v3967_v22  ;;  %3362 = vmatpush3.bf16.msra.mxu1 %v3969_v28 }
  0x18   :  { %3696 = vmatprep.subr.bf16.mxu0 %v3970_v24  ;;  %3363 = vmatprep.subr.bf16.mxu1 %v3971_v30 }
  0x19   :  { %208 = vperm.xlu1 %3952, %v33_v6  }
  0x1a   :  { %220 = vperm.xlu0 %3951, %v34_v10  }
  0x1b   :  { %3697 = vmatpush3.bf16.msra.mxu0 %v3970_v24  ;;  %3364 = vmatpush3.bf16.msra.mxu1 %v3972_v31 }
  0x1c   :  { %3698 = vmatprep.subr.bf16.mxu0 %v3973_v26  ;;  %3365 = vmatprep.subr.bf16.mxu1 %v3974_v33 }
  0x1d   :  { %232 = vperm.xlu1 %3952, %v35_v14  }
  0x1e   :  { %244 = vperm.xlu0 %3951, %v36_v13  }
  0x1f   :  { %3699 = vmatpush3.bf16.msra.mxu0 %v3973_v26  ;;  %3366 = vmatpush3.bf16.msra.mxu1 %v3975_v34 }
  0x20   :  { %3700 = vmatprep.subr.bf16.mxu0 %v3976_v29  ;;  %3367 = vmatprep.subr.bf16.mxu1 %v3977_v36 }
  0x21   :  { %256 = vperm.xlu1 %3952, %v37_v16  }
  0x22   :  { %268 = vperm.xlu0 %3951, %v38_v15  }
  0x23   :  { %3701 = vmatpush3.bf16.msra.mxu0 %v3976_v29  ;;  %3368 = vmatpush3.bf16.msra.mxu1 %v3978_v37 }
  0x24   :  { %3702 = vmatprep.subr.bf16.mxu0 %v3979_v32  ;;  %3369 = vmatprep.subr.bf16.mxu1 %v3980_v39 }
  0x26   :  { %3953 = vset.pattern.permute.xlu0 %v4114_v1 }
  0x27   :  { %3703 = vmatpush3.bf16.msra.mxu0 %v3979_v32  ;;  %3370 = vmatpush3.bf16.msra.mxu1 %v3981_v40 }
  0x28   :  { %3704 = vmatprep.subr.bf16.mxu0 %v3982_v35  ;;  %3371 = vmatprep.subr.bf16.mxu1 %v3983_v41 }
  0x2b   :  { %3705 = vmatpush3.bf16.msra.mxu0 %v3982_v35  ;;  %3372 = vmatpush3.bf16.msra.mxu1 %v3984_v42 }
  0x2c   :  { %3714 = vmatprep.subr.bf16.mxu0 %v4279_v38  ;;  %3409 = vmatprep.subr.bf16.mxu1 %v3986_v43 }
  0x83   :  { %v330_v44 = vpop.permute.xlu1 %329 }
  0x84   :  { %v308_v45 = vpop.permute.xlu0 %307  ;;  %v338_v0 = vrot.slane %v330_v44, %v4305_v60 }
  0x85   :  { %v316_v1 = vrot.slane %v308_v45, %v4305_v60 }
  0x87   :  { %v341_v46 = vpop.permute.xlu1 %340 }
  0x88   :  { %v319_v47 = vpop.permute.xlu0 %318  ;;  %v349_v3 = vrot.slane %v341_v46, %v4305_v60 }
  0x89   :  { %v327_v5 = vrot.slane %v319_v47, %v4305_v60 }
  0x8a   :  { %v4325_v17 = vcombine.low %v338_v0, %v349_v3 }
  0x8b   :  { %v4297_v48 = vpop.permute.xlu1 %362  ;;  %v4328_v19 = vcombine.low %v316_v1, %v327_v5 }
  0x8c   :  { %v4299_v49 = vpop.permute.xlu0 %351  ;;  %v371_v24 = vrot.slane %v4297_v48, %v4305_v60 }
  0x8d   :  { %v360_v29 = vrot.slane %v4299_v49, %v4305_v60 }
  0x8f   :  { %v4301_v50 = vpop.permute.xlu1 %384 }
  0x90   :  { %v4303_v51 = vpop.permute.xlu0 %373  ;;  %v393_v30 = vrot.slane %v4301_v50, %v4305_v60 }
  0x91   :  { %v382_v31 = vrot.slane %v4303_v51, %v4305_v60 }
  0x93   :  { %v4411_v48 = vcombine.low %v382_v31, %v393_v30 }
  0x94   :  { %v197_v52 = vpop.permute.xlu1 %196 }
  0x95   :  { %v185_v58 = vpop.permute.xlu0 %184  ;;  %v205_v11 = vrot.slane %v197_v52, %v4305_v60 }
  0x96   :  { %v193_v12 = vrot.slane %v185_v58, %v4305_v60 }
  0x98   :  { %v209_v59 = vpop.permute.xlu1 %208  ;;  %v4336_v25 = vcombine.low %v193_v12, %v205_v11  ;;  %v466_v12 = vld [vmem:[#allocation2] sm:$0xf0] }
  0x99   :  { %v221_v62 = vpop.permute.xlu0 %220  ;;  %v217_v9 = vrot.slane %v209_v59, %v4305_v60 }
  0x9a   :  { %v229_v10 = vrot.slane %v221_v62, %v4305_v60 }
  0x9c   :  { %v4312_v63 = vpop.permute.xlu1 %232  ;;  %v4330_v22 = vcombine.low %v217_v9, %v229_v10 }
  0x9d   :  { %v245_v28 = vpop.permute.xlu0 %244  ;;  %v241_v34 = vrot.slane %v4312_v63, %v4305_v60 }
  0x9e   :  { %v253_v35 = vrot.slane %v245_v28, %v4305_v60 }
  0xa0   :  { %v4332_v23 = vpop.permute.xlu1 %256  ;;  %v4384_v28 = vcombine.low %v241_v34, %v253_v35 }
  0xa1   :  { %v265_v37 = vrot.slane %v4332_v23, %v4305_v60  ;;  %v269_v63 = vpop.permute.xlu0 %268 }
  0xe1   :  { %v3684_v4 = vpop.f32.mrb[0].mxu0 }
  0xe2   :  { %v148_v6 = vadd.f32 %v3684_v4, %v4310_v61  ;;  %v139_v7 = vpop.f32.mrb[1].mxu0 }
  0xe3   :  { %v140_v13 = vadd.f32 %v4310_v61, %v139_v7  ;;  %v3685_v14 = vpop.f32.mrb[2].mxu0 }
  0xe4   :  { %v151_v15 = vadd.f32 %v3685_v14, %v4310_v61  ;;  %v142_v16 = vpop.f32.mrb[3].mxu0  ;;  %v172_v20 = vmax.f32 %v148_v6, 0.0 }
  0xe5   :  { %v143_v18 = vadd.f32 %v4310_v61, %v142_v16  ;;  %v170_v26 = vmax.f32 %v140_v13, 0.0 }
  0xe6   :  { %v173_v21 = vmax.f32 %v151_v15, 0.0  ;;  %v277_v15 = vrot.slane %v269_v63, %v4305_v60 }
  0xe7   :  { %v171_v27 = vmax.f32 %v143_v18, 0.0 }
  0xe8   :  { %v4344_v32 = vpack.c.bf16 %v173_v21, %v172_v20  ;;  %v543_v20 = vld [vmem:[#allocation2 + $0x10] sm:$0xf8]  ;;  %v4403_v35 = vcombine.low %v265_v37, %v277_v15 }
  0xe9   :  { %v178_v33 = vpack.c.bf16 %v171_v27, %v170_v26  ;;  %v3688_v36 = vpop.f32.mrb[4].mxu0 }
  0xea   :  { %v419_v39 = vmul.bf16 %v4325_v17, %v4344_v32  ;;  %v483_v40 = vrot.slane %v4344_v32, 4  ;;  %v303_v41 = vmul.bf16 %v4330_v22, %v4344_v32  ;;  %v164_v42 = vadd.f32 %v3688_v36, %v4310_v61  ;;  %v155_v43 = vpop.f32.mrb[5].mxu0 }
  0xeb   :  { %v302_v44 = vmul.bf16 %v4336_v25, %v178_v33  ;;  %v418_v45 = vmul.bf16 %v4328_v19, %v178_v33  ;;  %v482_v46 = vrot.slane %v178_v33, 4  ;;  %v156_v47 = vadd.f32 %v4310_v61, %v155_v43  ;;  %v3689_v49 = vpop.f32.mrb[6].mxu0 }
  0xec   :  { %v509_v52 = vshrl.u32 %v419_v39, 16  ;;  %v512_v53 = vshll.u32 %v419_v39, 16  ;;  %v432_v54 = vshrl.u32 %v303_v41, 16  ;;  %v435_v55 = vshll.u32 %v303_v41, 16  ;;  %v158_v56 = vpop.f32.mrb[7].mxu0 }
  0xed   :  { %v424_v57 = vshrl.u32 %v302_v44, 16  ;;  %v427_v58 = vshll.u32 %v302_v44, 16  ;;  %v4363_v59 = vsel %vm481_vm2, %v482_v46, %v483_v40  ;;  %494 = vst [vmem:[#allocation2 + $0x8] sm:$0xf0] %v482_v46  ;;  %v501_v62 = vshrl.u32 %v418_v45, 16 }
  0xee   :  { %v511_v0 = vrot.slane %v509_v52, 4  ;;  %v514_v1 = vrot.slane %v512_v53, 5  ;;  %v504_v3 = vshll.u32 %v418_v45, 16  ;;  %v434_v4 = vrot.slane %v432_v54, 3  ;;  %v1893_v52 = vld [vmem:[#allocation2 + $0xe8] sm:$0xf] }
  0xef   :  { %v426_v5 = vrot.slane %v424_v57, 3  ;;  %v429_v6 = vrot.slane %v427_v58, 4  ;;  %v503_v7 = vrot.slane %v501_v62, 4  ;;  %v437_v9 = vrot.slane %v435_v55, 4  ;;  %v550_v57 = vld [vmem:[#allocation2 + $0x70] sm:$0xf] }
  0xf0   :  { %v4365_v10 = vor.u32 %v514_v1, %v511_v0  ;;  %v506_v13 = vrot.slane %v504_v3, 5  ;;  %v176_v14 = vmax.f32 %v164_v42, 0.0  ;;  %v167_v23 = vadd.f32 %v3689_v49, %v4310_v61 }
  0xf1   :  { %v430_v16 = vor.u32 %v429_v6, %v426_v5  ;;  %v4380_v21 = vor.u32 %v437_v9, %v434_v4  ;;  %v159_v26 = vadd.f32 %v4310_v61, %v158_v56  ;;  %v174_v33 = vmax.f32 %v156_v47, 0.0 }
  0xf2   :  { %v507_v27 = vor.u32 %v506_v13, %v503_v7  ;;  %v177_v41 = vmax.f32 %v167_v23, 0.0  ;;  %v4395_v43 = vcombine.low %v360_v29, %v371_v24  ;;  %v703_v37 = vrot.slane %v4363_v59, 4 }
  0xf3   :  { %v467_v36 = vsel %vm4369_vm9, %v430_v16, %v466_v12  ;;  %v4390_v39 = vsel %vm422_vm7, %v430_v16, %v4380_v21  ;;  %v175_v42 = vmax.f32 %v159_v26, 0.0 }
  0xf4   :  { %468 = vst [vmem:[#allocation2] sm:$0xf0] %v467_v36  ;;  %v4399_v61 = vsel %vm499_vm8, %v507_v27, %v4365_v10  ;;  %v544_v34 = vsel %vm4376_vm10, %v507_v27, %v543_v20  ;;  %v630_v44 = vld [vmem:[#allocation2 + $0x8] sm:$0xf0]  ;;  %v181_v24 = vpack.c.bf16 %v177_v41, %v176_v14 }
  0xf5   :  { %545 = vst [vmem:[#allocation2 + $0x10] sm:$0xf8] %v544_v34  ;;  %v180_v29 = vpack.c.bf16 %v175_v42, %v174_v33  ;;  %v702_v45 = vrot.slane %v630_v44, 4  ;;  %v706_v31 = vrot.slane %v4399_v61, 4 }
  0xf6   :  { %565 = vst [vmem:[#allocation2 + $0x10] sm:$0xf] %v4115_v2  ;;  %v421_v46 = vmul.bf16 %v4411_v48, %v181_v24  ;;  %v487_v47 = vrot.slane %v181_v24, 4  ;;  %v305_v60 = vmul.bf16 %v4403_v35, %v181_v24  ;;  %v474_v24 = vld [vmem:[#allocation2 + $0x60] sm:$0x1f] }
  0xf7   :  { %v304_v50 = vmul.bf16 %v4384_v28, %v180_v29  ;;  %v420_v49 = vmul.bf16 %v4395_v43, %v180_v29  ;;  %v485_v51 = vrot.slane %v180_v29, 4  ;;  %v704_v30 = vsel %vm481_vm2, %v702_v45, %v703_v37 }
  0xf8   :  { %498 = vst [vmem:[#allocation2 + $0x68] sm:$0xf] %v487_v47  ;;  %v527_v53 = vshrl.u32 %v421_v46, 16  ;;  %v530_v54 = vshll.u32 %v421_v46, 16  ;;  %914 = vmatprep.mubr.bf16.mxu1 %v704_v30  ;;  %v450_v12 = vshrl.u32 %v305_v60, 16  ;;  %v453_v16 = vshll.u32 %v305_v60, 16 }
  0xf9   :  { %v441_v55 = vshrl.u32 %v304_v50, 16  ;;  %v444_v56 = vshll.u32 %v304_v50, 16  ;;  %v4431_v58 = vsel %vm481_vm2, %v483_v40, %v485_v51  ;;  %v4434_v62 = vsel %vm481_vm2, %v485_v51, %v487_v47  ;;  %v4068_v30 = vld [vmem:[%s5151_s3 + $0x50] sm:$0xff]  }
  0xfa   :  { %v518_v63 = vshrl.u32 %v420_v49, 16  ;;  %v521_v0 = vshll.u32 %v420_v49, 16  ;;  %v529_v3 = vrot.slane %v527_v53, 4  ;;  %v532_v4 = vrot.slane %v530_v54, 5 }
  0xfb   :  { %v555_v1 = vld [vmem:[#allocation2] sm:$0x10]  ;;  %v443_v5 = vrot.slane %v441_v55, 3  ;;  %v446_v6 = vrot.slane %v444_v56, 4  ;;  %v452_v26 = vrot.slane %v450_v12, 3  ;;  %v455_v36 = vrot.slane %v453_v16, 4 }
  0xfc   :  { %v556_v7 = vsel %vm4424_vm13, 0, %v555_v1  ;;  %v520_v40 = vrot.slane %v518_v63, 4  ;;  %v523_v9 = vrot.slane %v521_v0, 5  ;;  %v631_v13 = vld [vmem:[#allocation2 + $0x10] sm:$0xf0]  ;;  %v533_v14 = vor.u32 %v532_v4, %v529_v3  ;;  %v3989_v55 = vld [vmem:[%s5151_s3 + $0x48] sm:$0xff]  }
  0xfd   :  { %557 = vst [vmem:[#allocation2] sm:$0x10] %v556_v7  ;;  %v447_v15 = vor.u32 %v446_v6, %v443_v5  ;;  %v705_v20 = vrot.slane %v631_v13, 4  ;;  %v710_v60 = vrot.slane %v4431_v58, 4  ;;  %v700_v54 = vrot.slane %v4390_v39, 4  ;;  %v3990_v1 = vld [vmem:[%s5151_s3 + $0x8] sm:$0xff]  }
  0xfe   :  { %v524_v23 = vor.u32 %v523_v9, %v520_v40  ;;  %v551_v27 = vsel %vm4440_vm14, %v533_v14, %v550_v57  ;;  %v3992_v3 = vld [vmem:[%s5151_s3 + $0x50] sm:$0xff]   ;;  %v716_v5 = vrot.slane %v4434_v62, 4  ;;  %v3995_v7 = vld [vmem:[%s5151_s3 + $0x58] sm:$0xff]   ;;  %v3997_v9 = vld [vmem:[%s5151_s3 + $0xa0] sm:$0xff]  }
  0xff   :  { %v4448_v33 = vsel %vm422_vm7, %v4380_v21, %v447_v15  ;;  %v707_v41 = vsel %vm481_vm2, %v705_v20, %v706_v31  ;;  %552 = vst [vmem:[#allocation2 + $0x70] sm:$0xf] %v551_v27  ;;  %v456_v21 = vor.u32 %v455_v36, %v452_v26  ;;  %v711_v0 = vsel %vm481_vm2, %v703_v37, %v710_v60  ;;  %v3994_v37 = vld [vmem:[%s5151_s3 + $0x98] sm:$0xff]   ;;  %v3993_v6 = vld [vmem:[%s5151_s3 + $0x10] sm:$0xff]   ;;  %v633_v16 = vld [vmem:[#allocation2 + $0x68] sm:$0xf] }
 0x100   :  { %v4453_v42 = vsel %vm499_vm8, %v4365_v10, %v524_v23  ;;  %v4456_v34 = vsel %vm499_vm8, %v524_v23, %v533_v14  ;;  %3706 = vmatprep.mubr.bf16.mxu0 %v707_v41  ;;  %v3988_v10 = vld [vmem:[%s5151_s3 + $0x88] sm:$0xff]   ;;  %v708_v4 = vrot.slane %v4448_v33, 4  ;;  %v717_v13 = vsel %vm481_vm2, %v710_v60, %v716_v5  ;;  %v3998_v20 = vld [vmem:[%s5151_s3 + $0x60] sm:$0xff]   ;;  %v571_v36 = vld [vmem:[#allocation2 + $0x10] sm:$0xff] }
 0x101   :  { %v712_v29 = vrot.slane %v4453_v42, 4  ;;  %v718_v45 = vrot.slane %v4456_v34, 4  ;;  %v4470_v46 = vsel %vm422_vm7, %v447_v15, %v456_v21  ;;  %v475_v47 = vsel %vm4460_vm15, %v456_v21, %v474_v24  ;;  %v3996_v15 = vld [vmem:[%s5151_s3 + $0x18] sm:$0xff]   ;;  %v4000_v27 = vld [vmem:[%s5151_s3 + $0xa8] sm:$0xff]   ;;  %v3999_v24 = vld [vmem:[%s5151_s3 + $0x20] sm:$0xff]  }
 0x102   :  { %476 = vst [vmem:[#allocation2 + $0x60] sm:$0x1f] %v475_v47  ;;  %v709_v40 = vsel %vm481_vm2, %v700_v54, %v708_v4  ;;  %v714_v26 = vrot.slane %v4470_v46, 4  ;;  %v722_v41 = vrot.slane %v633_v16, 4  ;;  %v4001_v21 = vld [vmem:[%s5151_s3 + $0x68] sm:$0xff]   ;;  %v4006_v60 = vld [vmem:[%s5151_s3 + $0xb8] sm:$0xff]  }
 0x103   :  { %v713_v50 = vsel %vm481_vm2, %v706_v31, %v712_v29  ;;  %v719_v51 = vsel %vm481_vm2, %v712_v29, %v718_v45  ;;  %566 = vst [vmem:[#allocation2 + $0x60] sm:$0xf0] %v4115_v2  ;;  %v3987_v31 = vld [vmem:[%s5151_s3] sm:$0xff]   ;;  %v4027_v16 = vld [vmem:[%s5151_s3 + $0x230] sm:$0xff]  }
 0x104   :  { %3707 = vmatmul.mubr.bf16.vlgmr.msra.gmra.mrb[8].mxu0 %v713_v50  ;;  %v629_v49 = vld [vmem:[#allocation2] sm:$0xf0]  ;;  %v715_v29 = vsel %vm481_vm2, %v708_v4, %v714_v26  ;;  %v4002_v50 = vld [vmem:[%s5151_s3 + $0x28] sm:$0xff]   ;;  %v4015_v4 = vld [vmem:[%s5151_s3 + $0x210] sm:$0xff]  }
 0x105   :  { %3715 = vmatpush3.bf16.msra.mxu0 %v4279_v38  ;;  %v699_v53 = vrot.slane %v629_v49, 4  ;;  %3710 = vmatprep.mubr.bf16.mxu0 %v719_v51  ;;  %v3991_v38 = vld [vmem:[%s5151_s3 + $0x90] sm:$0xff]  }
 0x106   :  { %3716 = vmatprep.subr.bf16.mxu0 %v3988_v10  ;;  %v560_v56 = vld [vmem:[#allocation2 + $0x70] sm:$0x8] }
 0x107   :  { %v701_v57 = vsel %vm481_vm2, %v699_v53, %v700_v54  ;;  %v561_v63 = vsel %vm4478_vm4, 0, %v560_v56  ;;  %v4004_v49 = vld [vmem:[%s5151_s3 + $0x70] sm:$0xff]   ;;  %v4007_v54 = vld [vmem:[%s5151_s3 + $0x78] sm:$0xff]   ;;  %v570_v56 = vld [vmem:[#allocation2 + $0x8] sm:$0xff] }
 0x108   :  { %915 = vmatmul.mubr.bf16.vlgmr.msra.gmra.mrb[0].mxu1 %v701_v57  ;;  %562 = vst [vmem:[#allocation2 + $0x70] sm:$0x8] %v561_v63  ;;  %v4005_v53 = vld [vmem:[%s5151_s3 + $0x30] sm:$0xff]   ;;  %v4008_v57 = vld [vmem:[%s5151_s3 + $0x38] sm:$0xff]   ;;  %v4012_v63 = vld [vmem:[%s5151_s3 + $0x208] sm:$0xff]  }
 0x109   :  { %922 = vmatprep.mubr.bf16.mxu1 %v711_v0  ;;  %3410 = vmatpush3.bf16.msra.mxu1 %v3987_v31  ;;  %v632_v47 = vld [vmem:[#allocation2 + $0x60] sm:$0xf] }
 0x10a   :  { %3717 = vmatpush3.bf16.msra.mxu0 %v3988_v10  ;;  %3411 = vmatprep.subr.bf16.mxu1 %v3989_v55  ;;  %v723_v10 = vsel %vm481_vm2, %v716_v5, %v722_v41  ;;  %v720_v51 = vrot.slane %v632_v47, 4  ;;  %v4009_v55 = vld [vmem:[%s5151_s3 + $0x200] sm:$0xff]   ;;  %v4016_v5 = vld [vmem:[%s5151_s3 + $0x1d0] sm:$0xff]   ;;  %v4032_v41 = vld [vmem:[%s5151_s3 + $0x1b8] sm:$0xff]  }
 0x10b   :  { %3718 = vmatprep.subr.bf16.mxu0 %v3991_v38  ;;  %v4011_v0 = vld [vmem:[%s5151_s3 + $0x180] sm:$0xff]   ;;  %v4043_v47 = vld [vmem:[%s5151_s3 + $0x150] sm:$0xff]  }
 0x10c   :  { %v721_v31 = vsel %vm481_vm2, %v714_v26, %v720_v51  ;;  %v4030_v26 = vld [vmem:[%s5151_s3 + $0x238] sm:$0xff]   ;;  %v4042_v51 = vld [vmem:[%s5151_s3 + $0xc8] sm:$0xff]  }
 0x10d   :  { %3412 = vmatpush3.bf16.msra.mxu1 %v3990_v1  ;;  %v4013_v1 = vld [vmem:[%s5151_s3 + $0x1c8] sm:$0xff]  }
 0x10e   :  { %3719 = vmatpush3.bf16.msra.mxu0 %v3991_v38  ;;  %3413 = vmatprep.subr.bf16.mxu1 %v3992_v3  ;;  %v4010_v38 = vld [vmem:[%s5151_s3 + $0x1c0] sm:$0xff]  }
 0x10f   :  { %3720 = vmatprep.subr.bf16.mxu0 %v3994_v37  ;;  %v634_v12 = vld [vmem:[#allocation2 + $0x70] sm:$0xf]  ;;  %v569_v3 = vld [vmem:[#allocation2] sm:$0xff] }
 0x110   :  { %923 = vmatmul.mubr.bf16.gmra.mrb[4].mxu1 %v709_v40  ;;  %v724_v14 = vrot.slane %v634_v12, 4  ;;  %v4019_v40 = vld [vmem:[%s5151_s3 + $0x1d8] sm:$0xff]  }
 0x111   :  { %930 = vmatprep.mubr.bf16.mxu1 %v717_v13  ;;  %3414 = vmatpush3.bf16.msra.mxu1 %v3993_v6  ;;  %v4018_v6 = vld [vmem:[%s5151_s3 + $0x218] sm:$0xff]   ;;  %v4024_v13 = vld [vmem:[%s5151_s3 + $0x228] sm:$0xff]  }
 0x112   :  { %3721 = vmatpush3.bf16.msra.mxu0 %v3994_v37  ;;  %3415 = vmatprep.subr.bf16.mxu1 %v3995_v7  ;;  %v725_v23 = vsel %vm481_vm2, %v718_v45, %v724_v14  ;;  %v4003_v45 = vld [vmem:[%s5151_s3 + $0xb0] sm:$0xff]   ;;  %v4014_v37 = vld [vmem:[%s5151_s3 + $0x188] sm:$0xff]   ;;  %v4020_v12 = vld [vmem:[%s5151_s3 + $0x198] sm:$0xff]  }
 0x113   :  { %3722 = vmatprep.subr.bf16.mxu0 %v3997_v9  ;;  %3711 = vmatmul.mubr.bf16.gmra.mrb[12].mxu0 %v725_v23  ;;  %v4017_v7 = vld [vmem:[%s5151_s3 + $0x190] sm:$0xff]   ;;  %v4023_v14 = vld [vmem:[%s5151_s3 + $0x1a0] sm:$0xff]  }
 0x114   :  { %3730 = vmatprep.mubr.bf16.mxu0 %v571_v36  ;;  %v4028_v23 = vld [vmem:[%s5151_s3 + $0x1f0] sm:$0xff]   ;;  %v4031_v36 = vld [vmem:[%s5151_s3 + $0x1f8] sm:$0xff]  }
 0x115   :  { %3416 = vmatpush3.bf16.msra.mxu1 %v3996_v15  ;;  %v4025_v15 = vld [vmem:[%s5151_s3 + $0x1e8] sm:$0xff]  }
 0x116   :  { %3723 = vmatpush3.bf16.msra.mxu0 %v3997_v9  ;;  %3417 = vmatprep.subr.bf16.mxu1 %v3998_v20  ;;  %v4021_v9 = vld [vmem:[%s5151_s3 + $0x220] sm:$0xff]   ;;  %v4026_v20 = vld [vmem:[%s5151_s3 + $0x1a8] sm:$0xff]  }
 0x117   :  { %3724 = vmatprep.subr.bf16.mxu0 %v4000_v27 }
 0x118   :  { %931 = vmatmul.mubr.bf16.gmra.mrb[8].mxu1 %v715_v29  ;;  %v4037_v29 = vld [vmem:[%s5151_s3 + $0x140] sm:$0xff]  }
 0x119   :  { %938 = vmatprep.mubr.bf16.mxu1 %v723_v10  ;;  %3418 = vmatpush3.bf16.msra.mxu1 %v3999_v24  ;;  %v4109_v24 = vld [vmem:[%s5148_s1] sm:$0xff]  }
 0x11a   :  { %3725 = vmatpush3.bf16.msra.mxu0 %v4000_v27  ;;  %3419 = vmatprep.subr.bf16.mxu1 %v4001_v21  ;;  %v4029_v27 = vld [vmem:[%s5151_s3 + $0x1b0] sm:$0xff]   ;;  %v4033_v21 = vld [vmem:[%s5149_s0 + $0x20] sm:$0xff]  }
 0x11b   :  { %3726 = vmatprep.subr.bf16.mxu0 %v4003_v45  ;;  %v4039_v10 = vld [vmem:[%s5151_s3 + $0xc0] sm:$0xff]  }
 0x11d   :  { %3420 = vmatpush3.bf16.msra.mxu1 %v4002_v50  ;;  %v4046_v50 = vld [vmem:[%s5151_s3 + $0x158] sm:$0xff]  }
 0x11e   :  { %3727 = vmatpush3.bf16.msra.mxu0 %v4003_v45  ;;  %3421 = vmatprep.subr.bf16.mxu1 %v4004_v49  ;;  %v4038_v45 = vld [vmem:[%s5151_s3 + $0x100] sm:$0xff]   ;;  %v4041_v49 = vld [vmem:[%s5151_s3 + $0x108] sm:$0xff]  }
 0x11f   :  { %3728 = vmatprep.subr.bf16.mxu0 %v4006_v60 }
 0x120   :  { %939 = vmatmul.mubr.bf16.gmra.mrb[12].mxu1 %v721_v31  ;;  %v4052_v31 = vld [vmem:[%s5151_s3 + $0x168] sm:$0xff]  }
 0x121   :  { %3422 = vmatpush3.bf16.msra.mxu1 %v4005_v53  ;;  %1188 = vmatprep.mubr.bf16.mxu1 %v570_v56  ;;  %v4044_v53 = vld [vmem:[%s5151_s3 + $0x110] sm:$0xff]   ;;  %v4048_v56 = vld [vmem:[%s5151_s3 + $0xd8] sm:$0xff]  }
 0x122   :  { %3729 = vmatpush3.bf16.msra.mxu0 %v4006_v60  ;;  %3423 = vmatprep.subr.bf16.mxu1 %v4007_v54  ;;  %v4049_v60 = vld [vmem:[%s5151_s3 + $0x160] sm:$0xff]   ;;  %v4045_v54 = vld [vmem:[%s5151_s3 + $0xd0] sm:$0xff]  }
 0x123   :  { %3738 = vmatprep.subr.bf16.mxu0 %v4009_v55 }
 0x125   :  { %3424 = vmatpush3.bf16.msra.mxu1 %v4008_v57  ;;  %3731 = vmatmul.mubr.bf16.vlgmr.msra.gmra.mrb[8].mxu0 %v4399_v61  ;;  %v4055_v57 = vld [vmem:[%s5151_s3 + $0x170] sm:$0xff]  }
 0x126   :  { %3734 = vmatprep.mubr.bf16.mxu0 %v4453_v42  ;;  %3739 = vmatpush3.bf16.msra.mxu0 %v4009_v55  ;;  %v4047_v55 = vld [vmem:[%s5151_s3 + $0x118] sm:$0xff]  }
 0x127   :  { %3461 = vmatprep.subr.bf16.mxu1 %v4010_v38  ;;  %3740 = vmatprep.subr.bf16.mxu0 %v4012_v63  ;;  %v4050_v38 = vld [vmem:[%s5151_s3 + $0x120] sm:$0xff]  }
 0x128   :  { %1189 = vmatmul.mubr.bf16.vlgmr.msra.gmra.mrb[16].mxu1 %v569_v3  ;;  %v4054_v3 = vld [vmem:[%s5151_s3 + $0xe8] sm:$0xff]  }
 0x129   :  { %1196 = vmatprep.mubr.bf16.mxu1 %v4363_v59  ;;  %3462 = vmatpush3.bf16.msra.mxu1 %v4011_v0  ;;  %v4058_v0 = vld [vmem:[%s5151_s3 + $0x178] sm:$0xff]  }
 0x12a   :  { %3741 = vmatpush3.bf16.msra.mxu0 %v4012_v63  ;;  %3463 = vmatprep.subr.bf16.mxu1 %v4013_v1  ;;  %v4051_v63 = vld [vmem:[%s5151_s3 + $0xe0] sm:$0xff]   ;;  %v4053_v1 = vld [vmem:[%s5151_s3 + $0x128] sm:$0xff]  }
 0x12b   :  { %3742 = vmatprep.subr.bf16.mxu0 %v4015_v4 }
 0x12d   :  { %3464 = vmatpush3.bf16.msra.mxu1 %v4014_v37  ;;  %3735 = vmatmul.mubr.bf16.gmra.mrb[12].mxu0 %v4456_v34  ;;  %v4056_v37 = vld [vmem:[%s5151_s3 + $0x130] sm:$0xff]  }
 0x12e   :  { %3743 = vmatpush3.bf16.msra.mxu0 %v4015_v4  ;;  %3754 = vmatprep.mubr.bf16.mxu0 %v4399_v61  ;;  %v4022_v61 = vld [vmem:[%s5151_s3 + $0x1e0] sm:$0xff]  }
 0x12f   :  { %3465 = vmatprep.subr.bf16.mxu1 %v4016_v5  ;;  %3744 = vmatprep.subr.bf16.mxu0 %v4018_v6  ;;  %v4743_v4 = vld [vmem:[%s5151_s3 + $0x80] sm:$0xff]   ;;  %v4057_v5 = vld [vmem:[%s5151_s3 + $0xf0] sm:$0xff]  }
 0x130   :  { %1197 = vmatmul.mubr.bf16.gmra.mrb[20].mxu1 %v4390_v39 }
 0x131   :  { %1204 = vmatprep.mubr.bf16.mxu1 %v4431_v58  ;;  %3466 = vmatpush3.bf16.msra.mxu1 %v4017_v7  ;;  %v4060_v7 = vld [vmem:[%s5151_s3 + $0xf8] sm:$0xff]  }
 0x132   :  { %3745 = vmatpush3.bf16.msra.mxu0 %v4018_v6  ;;  %3467 = vmatprep.subr.bf16.mxu1 %v4019_v40  ;;  %v4059_v6 = vld [vmem:[%s5151_s3 + $0x138] sm:$0xff]   ;;  %v4062_v40 = vld [vmem:[%s5151_s3 + $0x40] sm:$0xff]  }
 0x133   :  { %3746 = vmatprep.subr.bf16.mxu0 %v4021_v9 }
 0x135   :  { %3468 = vmatpush3.bf16.msra.mxu1 %v4020_v12 }
 0x136   :  { %3747 = vmatpush3.bf16.msra.mxu0 %v4021_v9  ;;  %3469 = vmatprep.subr.bf16.mxu1 %v4022_v61 }
 0x137   :  { %3748 = vmatprep.subr.bf16.mxu0 %v4024_v13 }
 0x138   :  { %1205 = vmatmul.mubr.bf16.gmra.mrb[24].mxu1 %v4448_v33 }
 0x139   :  { %1212 = vmatprep.mubr.bf16.mxu1 %v4434_v62  ;;  %3470 = vmatpush3.bf16.msra.mxu1 %v4023_v14 }
 0x13a   :  { %3749 = vmatpush3.bf16.msra.mxu0 %v4024_v13  ;;  %3471 = vmatprep.subr.bf16.mxu1 %v4025_v15 }
 0x13b   :  { %3750 = vmatprep.subr.bf16.mxu0 %v4027_v16 }
 0x13d   :  { %3472 = vmatpush3.bf16.msra.mxu1 %v4026_v20 }
 0x13e   :  { %3751 = vmatpush3.bf16.msra.mxu0 %v4027_v16  ;;  %3473 = vmatprep.subr.bf16.mxu1 %v4028_v23 }
 0x13f   :  { %3752 = vmatprep.subr.bf16.mxu0 %v4030_v26 }
 0x140   :  { %1213 = vmatmul.mubr.bf16.gmra.mrb[28].mxu1 %v4470_v46 }
 0x141   :  { %3474 = vmatpush3.bf16.msra.mxu1 %v4029_v27  ;;  %1514 = vmatprep.mubr.bf16.mxu1 %v4363_v59  ;;  %v4110_v59 = vld [vmem:[%s5148_s1 + $0x8] sm:$0xff]  }
 0x142   :  { %3753 = vmatpush3.bf16.msra.mxu0 %v4030_v26  ;;  %3475 = vmatprep.subr.bf16.mxu1 %v4031_v36 }
 0x143   :  { %3762 = vmatprep.subr.bf16.mxu0 %v4109_v24 }
 0x145   :  { %3476 = vmatpush3.bf16.msra.mxu1 %v4032_v41  ;;  %3755 = vmatmul.mubr.bf16.vlgmr.msra.gmra.mrb[8].mxu0 %v4453_v42  ;;  %v4111_v42 = vld [vmem:[%s5148_s1 + $0x10] ss:$0 sps:$4 sm:$0x33]  }
 0x146   :  { %3758 = vmatprep.mubr.bf16.mxu0 %v4456_v34  ;;  %3763 = vmatpush3.bf16.msra.mxu0 %v4109_v24  ;;  %v1288_v34 = vld [vmem:[#allocation2 + $0x70] sm:$0xff] }
 0x147   :  { %3764 = vmatprep.subr.bf16.mxu0 %v4110_v59  ;;  %3520 = vmatprep.subr.bf16.mxu1 %v4038_v45 }
 0x148   :  { %1515 = vmatmul.mubr.bf16.vlgmr.msra.gmra.mrb[32].mxu1 %v4390_v39  ;;  %v4034_v39 = vld [vmem:[%s5149_s0 + $0x28] sm:$0xff]  }
 0x149   :  { %1522 = vmatprep.mubr.bf16.mxu1 %v4431_v58  ;;  %v4035_v58 = vld [vmem:[%s5149_s0 + $0x30] sm:$0xff]   ;;  %3521 = vmatpush3.bf16.msra.mxu1 %v4039_v10 }
 0x14a   :  { %3765 = vmatpush3.bf16.msra.mxu0 %v4110_v59  ;;  %3522 = vmatprep.subr.bf16.mxu1 %v4041_v49 }
 0x14b   :  { %3945 = vmatprep.subr.msk.bf16.mxu0 %vm101_vm1, %v4111_v42 }
 0x14d   :  { %3759 = vmatmul.mubr.bf16.gmra.mrb[12].mxu0 %v1288_v34  ;;  %3523 = vmatpush3.bf16.msra.mxu1 %v4042_v51 }
 0x14e   :  { %3767 = vmatpush3.bf16.msra.mxu0 %v4181_v8  ;;  %3768 = vmatprep.mubr.msk.bf16.mxu0 %vm88_vm0, %v4033_v21  ;;  %v1287_v8 = vld [vmem:[#allocation2 + $0x68] sm:$0xff] }
 0x14f   :  { %3776 = vmatprep.subr.bf16.mxu0 %v4037_v29  ;;  %3524 = vmatprep.subr.bf16.mxu1 %v4044_v53 }
 0x150   :  { %1523 = vmatmul.mubr.bf16.gmra.mrb[36].mxu1 %v4448_v33  ;;  %v1286_v33 = vld [vmem:[#allocation2 + $0x60] sm:$0xff] }
 0x151   :  { %1530 = vmatprep.mubr.bf16.mxu1 %v4434_v62  ;;  %v4036_v62 = vld [vmem:[%s5149_s0 + $0x38] sm:$0xff]   ;;  %3525 = vmatpush3.bf16.msra.mxu1 %v4045_v54 }
 0x152   :  { %3526 = vmatprep.subr.bf16.mxu1 %v4047_v55 }
 0x155   :  { %3769 = vmatmul.mubr.msk.bf16.vlgmr.msra.gmra.mrb[16].mxu0 %vm88_vm0, %v4034_v39  ;;  %3527 = vmatpush3.bf16.msra.mxu1 %v4048_v56 }
 0x156   :  { %3772 = vmatprep.mubr.msk.bf16.mxu0 %vm88_vm0, %v4035_v58  ;;  %3777 = vmatpush3.bf16.msra.mxu0 %v4037_v29 }
 0x157   :  { %3528 = vmatprep.subr.bf16.mxu1 %v4050_v38 }
 0x158   :  { %1531 = vmatmul.mubr.bf16.gmra.mrb[40].mxu1 %v4470_v46  ;;  %v4040_v46 = vld [vmem:[%s5151_s3 + $0x148] sm:$0xff]  }
 0x159   :  { %1538 = vmatprep.mubr.bf16.mxu1 %v1287_v8  ;;  %3778 = vmatprep.subr.bf16.mxu0 %v4040_v46 }
 0x15a   :  { %3779 = vmatpush3.bf16.msra.mxu0 %v4040_v46  ;;  %3529 = vmatpush3.bf16.msra.mxu1 %v4051_v63 }
 0x15b   :  { %3780 = vmatprep.subr.bf16.mxu0 %v4043_v47  ;;  %3530 = vmatprep.subr.bf16.mxu1 %v4053_v1 }
 0x15d   :  { %3773 = vmatmul.mubr.msk.bf16.gmra.mrb[20].mxu0 %vm88_vm0, %v4036_v62  ;;  %vm1642_vm0 = vcmask 64512  }
 0x15e   :  { %3781 = vmatpush3.bf16.msra.mxu0 %v4043_v47  ;;  %3531 = vmatpush3.bf16.msra.mxu1 %v4054_v3 }
 0x15f   :  { %3782 = vmatprep.subr.bf16.mxu0 %v4046_v50  ;;  %3532 = vmatprep.subr.bf16.mxu1 %v4056_v37 }
 0x160   :  { %1539 = vmatmul.mubr.bf16.gmra.mrb[44].mxu1 %v1286_v33 }
 0x162   :  { %3783 = vmatpush3.bf16.msra.mxu0 %v4046_v50  ;;  %3533 = vmatpush3.bf16.msra.mxu1 %v4057_v5 }
 0x163   :  { %3784 = vmatprep.subr.bf16.mxu0 %v4049_v60  ;;  %3534 = vmatprep.subr.bf16.mxu1 %v4059_v6 }
 0x166   :  { %3785 = vmatpush3.bf16.msra.mxu0 %v4049_v60  ;;  %3535 = vmatpush3.bf16.msra.mxu1 %v4060_v7 }
 0x167   :  { %3786 = vmatprep.subr.bf16.mxu0 %v4052_v31  ;;  %3572 = vmatprep.subr.bf16.mxu1 %v4062_v40 }
 0x16a   :  { %3787 = vmatpush3.bf16.msra.mxu0 %v4052_v31 }
 0x16b   :  { %3788 = vmatprep.subr.bf16.mxu0 %v4055_v57 }
 0x16e   :  { %3789 = vmatpush3.bf16.msra.mxu0 %v4055_v57 }
 0x16f   :  { %3790 = vmatprep.subr.bf16.mxu0 %v4058_v0 }
 0x172   :  { %3791 = vmatpush3.bf16.msra.mxu0 %v4058_v0 }
 0x173   :  { %3800 = vmatprep.subr.bf16.mxu0 %v4743_v4 }
 0x1db   :  { %v3373_v9 = vpop.f32.mrb[0].mxu1 }
 0x1dc   :  { %v3374_v12 = vpop.f32.mrb[1].mxu1 }
 0x1dd   :  { %v3375_v61 = vadd.f32 %v3374_v12, %v3373_v9  ;;  %v3376_v13 = vpop.f32.mrb[2].mxu1 }
 0x1de   :  { %v3377_v14 = vpop.f32.mrb[3].mxu1 }
 0x1df   :  { %v3378_v15 = vadd.f32 %v3377_v14, %v3376_v13 }
 0x1e3   :  { %v3379_v16 = vpop.f32.mrb[4].mxu1 }
 0x1e4   :  { %v3380_v20 = vpop.f32.mrb[5].mxu1 }
 0x1e5   :  { %v3381_v23 = vadd.f32 %v3380_v20, %v3379_v16  ;;  %v3382_v26 = vpop.f32.mrb[6].mxu1 }
 0x1e6   :  { %v3383_v27 = vpop.f32.mrb[7].mxu1 }
 0x1e7   :  { %v3384_v36 = vadd.f32 %v3383_v27, %v3382_v26 }
 0x1eb   :  { %v3385_v41 = vpop.f32.mrb[8].mxu1 }
 0x1ec   :  { %v3386_v24 = vpop.f32.mrb[9].mxu1 }
 0x1ed   :  { %v3387_v59 = vadd.f32 %v3386_v24, %v3385_v41  ;;  %v3388_v21 = vpop.f32.mrb[10].mxu1 }
 0x1ee   :  { %v3389_v42 = vpop.f32.mrb[11].mxu1 }
 0x1ef   :  { %v3390_v34 = vadd.f32 %v3389_v42, %v3388_v21 }
 0x1f3   :  { %v3391_v39 = vpop.f32.mrb[12].mxu1 }
 0x1f4   :  { %v3392_v58 = vpop.f32.mrb[13].mxu1 }
 0x1f5   :  { %v3393_v8 = vadd.f32 %v3392_v58, %v3391_v39  ;;  %v3394_v62 = vpop.f32.mrb[14].mxu1  ;;  %v4772_v58 = vld [vmem:[%s5153_s4] ss:$0 sm:$0xff] }
 0x1f6   :  { %v3395_v33 = vpop.f32.mrb[15].mxu1 }
 0x1f7   :  { %v3396_v29 = vadd.f32 %v3395_v33, %v3394_v62 }
 0x1fb   :  { %v3425_v46 = vpop.f32.mrb[16].mxu1 }
 0x1fc   :  { %v3426_v45 = vpop.f32.mrb[17].mxu1 }
 0x1fd   :  { %v3427_v10 = vadd.f32 %v3426_v45, %v3425_v46  ;;  %v3428_v47 = vpop.f32.mrb[18].mxu1 }
 0x1fe   :  { %v3429_v50 = vpop.f32.mrb[19].mxu1 }
 0x1ff   :  { %v3867_v49 = vadd.f32 %v3427_v10, %v3375_v61  ;;  %v3430_v51 = vadd.f32 %v3429_v50, %v3428_v47 }
 0x201   :  { %v3873_v60 = vadd.f32 %v3430_v51, %v3378_v15 }
 0x203   :  { %v3431_v53 = vpop.f32.mrb[20].mxu1 }
 0x204   :  { %v3432_v54 = vpop.f32.mrb[21].mxu1 }
 0x205   :  { %v3433_v31 = vadd.f32 %v3432_v54, %v3431_v53  ;;  %v3434_v55 = vpop.f32.mrb[22].mxu1 }
 0x206   :  { %v3435_v56 = vpop.f32.mrb[23].mxu1 }
 0x207   :  { %v3864_v57 = vadd.f32 %v3433_v31, %v3381_v23  ;;  %v3436_v38 = vadd.f32 %v3435_v56, %v3434_v55 }
 0x209   :  { %v3870_v63 = vadd.f32 %v3436_v38, %v3384_v36 }
 0x20b   :  { %v3437_v0 = vpop.f32.mrb[24].mxu1 }
 0x20c   :  { %v3438_v1 = vpop.f32.mrb[25].mxu1 }
 0x20d   :  { %v3439_v3 = vadd.f32 %v3438_v1, %v3437_v0  ;;  %v3440_v37 = vpop.f32.mrb[26].mxu1 }
 0x20e   :  { %v3441_v5 = vpop.f32.mrb[27].mxu1 }
 0x20f   :  { %v4761_v6 = vadd.f32 %v3439_v3, %v3387_v59  ;;  %v3442_v7 = vadd.f32 %v3441_v5, %v3440_v37  ;;  %v4793_v37 = vld [vmem:[%s5152_s2] ss:$0 sm:$0xff] }
 0x211   :  { %v4763_v40 = vadd.f32 %v3442_v7, %v3390_v34 }
 0x213   :  { %v3443_v9 = vpop.f32.mrb[28].mxu1 }
 0x214   :  { %v3444_v12 = vpop.f32.mrb[29].mxu1 }
 0x215   :  { %v3445_v61 = vadd.f32 %v3444_v12, %v3443_v9  ;;  %v3446_v13 = vpop.f32.mrb[30].mxu1 }
 0x216   :  { %v3447_v14 = vpop.f32.mrb[31].mxu1 }
 0x217   :  { %v4765_v15 = vadd.f32 %v3445_v61, %v3393_v8  ;;  %v3448_v16 = vadd.f32 %v3447_v14, %v3446_v13 }
 0x218   :  { %v3756_v20 = vpop.f32.mrb[8].mxu0 }
 0x219   :  { %v4767_v23 = vadd.f32 %v3448_v16, %v3396_v29  ;;  %v1581_v26 = vpop.f32.mrb[9].mxu0 }
 0x21a   :  { %v3757_v27 = vpop.f32.mrb[10].mxu0 }
 0x21b   :  { %v3477_v36 = vpop.f32.mrb[32].mxu1  ;;  %v1584_v41 = vpop.f32.mrb[11].mxu0 }
 0x21c   :  { %v3478_v24 = vpop.f32.mrb[33].mxu1 }
 0x21d   :  { %v3479_v59 = vadd.f32 %v3478_v24, %v3477_v36  ;;  %v3480_v21 = vpop.f32.mrb[34].mxu1 }
 0x21e   :  { %v3481_v42 = vpop.f32.mrb[35].mxu1 }
 0x21f   :  { %v3868_v34 = vadd.f32 %v3867_v49, %v3479_v59  ;;  %v3482_v39 = vadd.f32 %v3481_v42, %v3480_v21 }
 0x220   :  { %v4774_v8 = vpop.f32.mrb[12].mxu0 }
 0x221   :  { %v3869_v62 = vadd.f32 %v3868_v34, %v1581_v26  ;;  %v3874_v33 = vadd.f32 %v3873_v60, %v3482_v39  ;;  %v1597_v29 = vpop.f32.mrb[13].mxu0 }
 0x222   :  { %v4776_v46 = vpop.f32.mrb[14].mxu0 }
 0x223   :  { %v1626_v45 = vadd.f32 %v3869_v62, %v4772_v58  ;;  %v3875_v10 = vadd.f32 %v3874_v33, %v1584_v41  ;;  %v3483_v47 = vpop.f32.mrb[36].mxu1  ;;  %v4779_v50 = vpop.f32.mrb[15].mxu0 }
 0x224   :  { %v3484_v49 = vpop.f32.mrb[37].mxu1 }
 0x225   :  { %v1634_v51 = vmax.f32 %v1626_v45, 0.0  ;;  %v1627_v53 = vadd.f32 %v3875_v10, %v4772_v58  ;;  %v3485_v54 = vadd.f32 %v3484_v49, %v3483_v47  ;;  %v3486_v31 = vpop.f32.mrb[38].mxu1 }
 0x226   :  { %v3487_v55 = vpop.f32.mrb[39].mxu1 }
 0x227   :  { %1643 = vst.msk [vmem:[%s5154_s6] sm:$0xff] %vm1642_vm0, %v1634_v51  ;;  %v1635_v60 = vmax.f32 %v1627_v53, 0.0  ;;  %v3865_v56 = vadd.f32 %v3864_v57, %v3485_v54  ;;  %v3488_v38 = vadd.f32 %v3487_v55, %v3486_v31 }
 0x228   :  { %v3770_v0 = vpop.f32.mrb[16].mxu0 }
 0x229   :  { %1644 = vst.msk [vmem:[%s5154_s6 + $0x8] sm:$0xff] %vm1642_vm0, %v1635_v60  ;;  %v3866_v1 = vadd.f32 %v3865_v56, %v3756_v20  ;;  %v3871_v3 = vadd.f32 %v3870_v63, %v3488_v38  ;;  %v1734_v5 = vadd.f32 %v4793_v37, %v3770_v0  ;;  %v1725_v7 = vpop.f32.mrb[17].mxu0 }
 0x22a   :  { %v1726_v9 = vadd.f32 %v4793_v37, %v1725_v7  ;;  %v3771_v57 = vpop.f32.mrb[18].mxu0 }
 0x22b   :  { %v1628_v12 = vadd.f32 %v3866_v1, %v4772_v58  ;;  %v3872_v61 = vadd.f32 %v3871_v3, %v3757_v27  ;;  %v3489_v13 = vpop.f32.mrb[40].mxu1  ;;  %v1737_v14 = vadd.f32 %v4793_v37, %v3771_v57  ;;  %v1728_v16 = vpop.f32.mrb[19].mxu0  ;;  %v1758_v20 = vmax.f32 %v1734_v5, 0.0 }
 0x22c   :  { %v3490_v63 = vpop.f32.mrb[41].mxu1  ;;  %v1729_v26 = vadd.f32 %v4793_v37, %v1728_v16  ;;  %v1756_v42 = vmax.f32 %v1726_v9, 0.0 }
 0x22d   :  { %v1636_v36 = vmax.f32 %v1628_v12, 0.0  ;;  %v1629_v41 = vadd.f32 %v3872_v61, %v4772_v58  ;;  %v1759_v24 = vmax.f32 %v1737_v14, 0.0  ;;  %v3491_v59 = vadd.f32 %v3490_v63, %v3489_v13  ;;  %v3492_v21 = vpop.f32.mrb[42].mxu1 }
 0x22e   :  { %v1757_v34 = vmax.f32 %v1729_v26, 0.0  ;;  %v3493_v39 = vpop.f32.mrb[43].mxu1 }
 0x22f   :  { %1645 = vst.msk [vmem:[%s5154_s6 + $0x10] sm:$0xff] %vm1642_vm0, %v1636_v36  ;;  %v1637_v27 = vmax.f32 %v1629_v41, 0.0  ;;  %v4805_v62 = vpack.c.bf16 %v1759_v24, %v1758_v20  ;;  %v3880_v33 = vadd.f32 %v4761_v6, %v3491_v59  ;;  %v3494_v45 = vadd.f32 %v3493_v39, %v3492_v21  ;;  %v1817_v24 = vld [vmem:[#allocation2 + $0x78] sm:$0xf0] }
 0x230   :  { %v1764_v10 = vpack.c.bf16 %v1757_v34, %v1756_v42  ;;  %v3774_v47 = vpop.f32.mrb[20].mxu0 }
 0x231   :  { %1646 = vst.msk [vmem:[%s5154_s6 + $0x18] sm:$0xff] %vm1642_vm0, %v1637_v27  ;;  %v1769_v49 = vmul.bf16 %v4330_v22, %v4805_v62  ;;  %v1773_v51 = vmul.bf16 %v4325_v17, %v4805_v62  ;;  %v1831_v53 = vrot.slane %v4805_v62, 4  ;;  %v3881_v54 = vadd.f32 %v3880_v33, %v1597_v29  ;;  %v1741_v31 = vpop.f32.mrb[21].mxu0 }
 0x232   :  { %v1768_v6 = vmul.bf16 %v4336_v25, %v1764_v10  ;;  %v1772_v55 = vmul.bf16 %v4328_v19, %v1764_v10  ;;  %v1830_v60 = vrot.slane %v1764_v10, 4  ;;  %v3886_v56 = vadd.f32 %v4763_v40, %v3494_v45  ;;  %v3775_v38 = vpop.f32.mrb[22].mxu0 }
 0x233   :  { %v1785_v0 = vshrl.u32 %v1769_v49, 16  ;;  %v1788_v1 = vshll.u32 %v1769_v49, 16  ;;  %v1856_v3 = vshrl.u32 %v1773_v51, 16  ;;  %v1859_v5 = vshll.u32 %v1773_v51, 16  ;;  %v3495_v22 = vpop.f32.mrb[44].mxu1  ;;  %v1744_v7 = vpop.f32.mrb[23].mxu0 }
 0x234   :  { %v1630_v17 = vadd.f32 %v3881_v54, %v4772_v58  ;;  %v1777_v9 = vshrl.u32 %v1768_v6, 16  ;;  %v1780_v57 = vshll.u32 %v1768_v6, 16  ;;  %v4824_v25 = vsel %vm481_vm2, %v1830_v60, %v1831_v53  ;;  %1842 = vst [vmem:[#allocation2 + $0x80] sm:$0xf0] %v1830_v60  ;;  %v3496_v19 = vpop.f32.mrb[45].mxu1 }
 0x235   :  { %v1787_v29 = vrot.slane %v1785_v0, 3  ;;  %v1790_v40 = vrot.slane %v1788_v1, 4  ;;  %v1858_v12 = vrot.slane %v1856_v3, 4  ;;  %v1861_v61 = vrot.slane %v1859_v5, 5  ;;  %v3498_v13 = vpop.f32.mrb[46].mxu1 }
 0x236   :  { %v1638_v14 = vmax.f32 %v1630_v17, 0.0  ;;  %v1779_v16 = vrot.slane %v1777_v9, 3  ;;  %v1782_v20 = vrot.slane %v1780_v57, 4  ;;  %v1848_v63 = vshrl.u32 %v1772_v55, 16  ;;  %v3499_v26 = vpop.f32.mrb[47].mxu1 }
 0x237   :  { %v4826_v36 = vor.u32 %v1790_v40, %v1787_v29  ;;  %v4828_v41 = vor.u32 %v1861_v61, %v1858_v12  ;;  %v1851_v59 = vshll.u32 %v1772_v55, 16  ;;  %v3887_v21 = vadd.f32 %v3886_v56, %v4779_v50  ;;  %v1887_v54 = vld [vmem:[#allocation2 + $0x88] sm:$0xf8] }
 0x238   :  { %1647 = vst.msk [vmem:[%s5154_s6 + $0x20] sm:$0xff] %vm1642_vm0, %v1638_v14  ;;  %v1783_v42 = vor.u32 %v1782_v20, %v1779_v16  ;;  %v1850_v34 = vrot.slane %v1848_v63, 4  ;;  %v1750_v39 = vadd.f32 %v4793_v37, %v3774_v47  ;;  %v1742_v27 = vadd.f32 %v4793_v37, %v1741_v31 }
 0x239   :  { %v1853_v33 = vrot.slane %v1851_v59, 5  ;;  %v1631_v45 = vadd.f32 %v3887_v21, %v4772_v58  ;;  %v1753_v10 = vadd.f32 %v4793_v37, %v3775_v38  ;;  %v3497_v49 = vadd.f32 %v3496_v19, %v3495_v22  ;;  %v1823_v21 = vld [vmem:[#allocation2 + $0xd8] sm:$0x1f] }
 0x23a   :  { %v4841_v50 = vsel %vm422_vm7, %v1783_v42, %v4826_v36  ;;  %v1818_v51 = vsel %vm4369_vm9, %v1783_v42, %v1817_v24  ;;  %v1762_v6 = vmax.f32 %v1750_v39, 0.0  ;;  %v1760_v55 = vmax.f32 %v1742_v27, 0.0 }
 0x23b   :  { %1819 = vst [vmem:[#allocation2 + $0x78] sm:$0xf0] %v1818_v51  ;;  %v1854_v47 = vor.u32 %v1853_v33, %v1850_v34  ;;  %v1639_v60 = vmax.f32 %v1631_v45, 0.0  ;;  %v1763_v31 = vmax.f32 %v1753_v10, 0.0  ;;  %v3877_v56 = vadd.f32 %v4765_v15, %v3497_v49  ;;  %v1969_v0 = vld [vmem:[#allocation2 + $0x80] sm:$0xf0] }
 0x23c   :  { %v1745_v38 = vadd.f32 %v4793_v37, %v1744_v7  ;;  %v3500_v1 = vadd.f32 %v3499_v26, %v3498_v13  ;;  %v2040_v3 = vrot.slane %v1969_v0, 4  ;;  %v2041_v5 = vrot.slane %v4824_v25, 4 }
 0x23d   :  { %v4850_v11 = vsel %vm499_vm8, %v1854_v47, %v4828_v41  ;;  %v1888_v22 = vsel %vm4376_vm10, %v1854_v47, %v1887_v54  ;;  %1648 = vst.msk [vmem:[%s5154_s6 + $0x28] sm:$0xff] %vm1642_vm0, %v1639_v60  ;;  %v1767_v15 = vpack.c.bf16 %v1763_v31, %v1762_v6  ;;  %v3878_v17 = vadd.f32 %v3877_v56, %v4774_v8 }
 0x23e   :  { %1889 = vst [vmem:[#allocation2 + $0x88] sm:$0xf8] %v1888_v22  ;;  %v1761_v37 = vmax.f32 %v1745_v38, 0.0  ;;  %v3883_v7 = vadd.f32 %v4767_v23, %v3500_v1  ;;  %v2042_v9 = vsel %vm481_vm2, %v2040_v3, %v2041_v5  ;;  %v2044_v12 = vrot.slane %v4850_v11, 4 }
 0x23f   :  { %1904 = vst [vmem:[#allocation2 + $0x88] sm:$0xf] %v4115_v2  ;;  %v1771_v18 = vmul.bf16 %v4403_v35, %v1767_v15  ;;  %v1775_v57 = vmul.bf16 %v4411_v48, %v1767_v15  ;;  %v1835_v19 = vrot.slane %v1767_v15, 4  ;;  %v1632_v29 = vadd.f32 %v3878_v17, %v4772_v58  ;;  %2252 = vmatprep.mubr.bf16.mxu1 %v2042_v9 }
 0x240   :  { %v1766_v40 = vpack.c.bf16 %v1761_v37, %v1760_v55  ;;  %v3884_v8 = vadd.f32 %v3883_v7, %v4776_v46  ;;  %v4063_v7 = vld [vmem:[%s5151_s3] sm:$0xff]  }
 0x241   :  { %v1803_v23 = vshrl.u32 %v1771_v18, 16  ;;  %v1806_v61 = vshll.u32 %v1771_v18, 16  ;;  %1846 = vst [vmem:[#allocation2 + $0xe0] sm:$0xf] %v1835_v19  ;;  %v1874_v13 = vshrl.u32 %v1775_v57, 16  ;;  %v1877_v14 = vshll.u32 %v1775_v57, 16 }
 0x242   :  { %v1896_v16 = vld [vmem:[#allocation2 + $0x78] sm:$0x10]  ;;  %v1640_v20 = vmax.f32 %v1632_v29, 0.0  ;;  %v1770_v35 = vmul.bf16 %v4384_v28, %v1766_v40  ;;  %v1774_v48 = vmul.bf16 %v4395_v43, %v1766_v40  ;;  %v1833_v63 = vrot.slane %v1766_v40, 4  ;;  %v4064_v18 = vld [vmem:[%s5151_s3 + $0x88] sm:$0xff]  }
 0x243   :  { %v1897_v26 = vsel %vm4424_vm13, 0, %v1896_v16  ;;  %v1805_v24 = vrot.slane %v1803_v23, 3  ;;  %v1808_v59 = vrot.slane %v1806_v61, 4  ;;  %v1876_v46 = vrot.slane %v1874_v13, 4  ;;  %v4065_v57 = vld [vmem:[%s5151_s3 + $0x48] sm:$0xff]   ;;  %v4067_v23 = vld [vmem:[%s5151_s3 + $0x90] sm:$0xff]  }
 0x244   :  { %1898 = vst [vmem:[#allocation2 + $0x78] sm:$0x10] %v1897_v26  ;;  %v1879_v42 = vrot.slane %v1877_v14, 5  ;;  %1649 = vst.msk [vmem:[%s5154_s6 + $0x30] sm:$0xff] %vm1642_vm0, %v1640_v20  ;;  %v1794_v34 = vshrl.u32 %v1770_v35, 16  ;;  %v1797_v39 = vshll.u32 %v1770_v35, 16  ;;  %v4880_v28 = vsel %vm481_vm2, %v1831_v53, %v1833_v63 }
 0x245   :  { %v1809_v43 = vor.u32 %v1808_v59, %v1805_v24  ;;  %v4883_v27 = vsel %vm481_vm2, %v1833_v63, %v1835_v19  ;;  %v1865_v33 = vshrl.u32 %v1774_v48, 16  ;;  %v1868_v45 = vshll.u32 %v1774_v48, 16  ;;  %v1970_v10 = vld [vmem:[#allocation2 + $0x88] sm:$0xf0]  ;;  %v4069_v61 = vld [vmem:[%s5151_s3 + $0x10] sm:$0xff]   ;;  %v4070_v13 = vld [vmem:[%s5151_s3 + $0x98] sm:$0xff]  }
 0x246   :  { %v1880_v49 = vor.u32 %v1879_v42, %v1876_v46  ;;  %v1796_v51 = vrot.slane %v1794_v34, 3  ;;  %v1799_v54 = vrot.slane %v1797_v39, 4  ;;  %v1633_v6 = vadd.f32 %v3884_v8, %v4772_v58  ;;  %v4071_v16 = vld [vmem:[%s5151_s3 + $0x58] sm:$0xff]   ;;  %v4073_v24 = vld [vmem:[%s5151_s3 + $0xa0] sm:$0xff]   ;;  %v1910_v34 = vld [vmem:[#allocation2 + $0x88] sm:$0xff] }
 0x247   :  { %v1824_v55 = vsel %vm4460_vm15, %v1809_v43, %v1823_v21  ;;  %v1867_v62 = vrot.slane %v1865_v33, 4  ;;  %v1870_v47 = vrot.slane %v1868_v45, 5  ;;  %v2043_v53 = vrot.slane %v1970_v10, 4  ;;  %v4072_v63 = vld [vmem:[%s5151_s3 + $0x18] sm:$0xff]   ;;  %v4074_v46 = vld [vmem:[%s5151_s3 + $0x60] sm:$0xff]   ;;  %v4077_v33 = vld [vmem:[%s5151_s3 + $0x68] sm:$0xff]  }
 0x248   :  { %1825 = vst [vmem:[#allocation2 + $0xd8] sm:$0x1f] %v1824_v55  ;;  %v1894_v60 = vsel %vm4440_vm14, %v1880_v49, %v1893_v52  ;;  %v1800_v31 = vor.u32 %v1799_v54, %v1796_v51  ;;  %v1641_v56 = vmax.f32 %v1633_v6, 0.0  ;;  %v2048_v37 = vrot.slane %v4880_v28, 4  ;;  %v1972_v35 = vld [vmem:[#allocation2 + $0xe0] sm:$0xf] }
 0x249   :  { %1895 = vst [vmem:[#allocation2 + $0xe8] sm:$0xf] %v1894_v60  ;;  %1905 = vst [vmem:[#allocation2 + $0xd8] sm:$0xf0] %v4115_v2  ;;  %v1871_v0 = vor.u32 %v1870_v47, %v1867_v62  ;;  %v2045_v38 = vsel %vm481_vm2, %v2043_v53, %v2044_v12  ;;  %v2060_v21 = vrot.slane %v1972_v35, 4  ;;  %v4075_v39 = vld [vmem:[%s5151_s3 + $0x20] sm:$0xff]  }
 0x24a   :  { %v4894_v1 = vsel %vm422_vm7, %v4826_v36, %v1800_v31  ;;  %v4897_v44 = vsel %vm422_vm7, %v1800_v31, %v1809_v43  ;;  %1650 = vst.msk [vmem:[%s5154_s6 + $0x38] sm:$0xff] %vm1642_vm0, %v1641_v56  ;;  %3792 = vmatprep.mubr.bf16.mxu0 %v2045_v38  ;;  %v2038_v36 = vrot.slane %v4841_v50, 4  ;;  %v2049_v40 = vsel %vm481_vm2, %v2041_v5, %v2048_v37  ;;  %v4076_v43 = vld [vmem:[%s5151_s3 + $0xa8] sm:$0xff]   ;;  %v4079_v51 = vld [vmem:[%s5151_s3 + $0xb0] sm:$0xff]   ;;  %v4082_v62 = vld [vmem:[%s5151_s3 + $0xb8] sm:$0xff]  }
 0x24b   :  { %v4905_v32 = vsel %vm499_vm8, %v4828_v41, %v1871_v0  ;;  %v4908_v2 = vsel %vm499_vm8, %v1871_v0, %v1880_v49  ;;  %v1968_v3 = vld [vmem:[#allocation2 + $0x78] sm:$0xf0]  ;;  %v2054_v5 = vrot.slane %v4883_v27, 4  ;;  %v2052_v59 = vrot.slane %v4897_v44, 4  ;;  %v4078_v49 = vld [vmem:[%s5151_s3 + $0x28] sm:$0xff]   ;;  %v4080_v6 = vld [vmem:[%s5151_s3 + $0x70] sm:$0xff]  }
 0x24c   :  { %v2050_v22 = vrot.slane %v4905_v32, 4  ;;  %v2037_v15 = vrot.slane %v1968_v3, 4  ;;  %v2056_v17 = vrot.slane %v4908_v2, 4  ;;  %v4081_v55 = vld [vmem:[%s5151_s3 + $0x30] sm:$0xff]   ;;  %v4083_v53 = vld [vmem:[%s5151_s3 + $0x78] sm:$0xff]   ;;  %v1909_v60 = vld [vmem:[#allocation2 + $0x80] sm:$0xff] }
 0x24d   :  { %v2055_v20 = vsel %vm481_vm2, %v2048_v37, %v2054_v5  ;;  %v2061_v45 = vsel %vm481_vm2, %v2054_v5, %v2060_v21  ;;  %v4084_v31 = vld [vmem:[%s5151_s3 + $0x38] sm:$0xff]   ;;  %v5001_v56 = vld [vmem:[%s5151_s3 + $0x200] sm:$0xff]   ;;  %v5010_v38 = vld [vmem:[%s5151_s3 + $0x208] sm:$0xff]  }
 0x24e   :  { %v2051_v41 = vsel %vm481_vm2, %v2044_v12, %v2050_v22  ;;  %v2039_v9 = vsel %vm481_vm2, %v2037_v15, %v2038_v36  ;;  %v2057_v19 = vsel %vm481_vm2, %v2050_v22, %v2056_v17  ;;  %v4066_v12 = vld [vmem:[%s5151_s3 + $0x8] sm:$0xff]   ;;  %v4086_v0 = vld [vmem:[%s5151_s3 + $0x1c0] sm:$0xff]   ;;  %v1908_v22 = vld [vmem:[#allocation2 + $0x78] sm:$0xff] }
 0x24f   :  { %3793 = vmatmul.mubr.bf16.vlgmr.msra.gmra.mrb[24].mxu0 %v2051_v41  ;;  %2253 = vmatmul.mubr.bf16.vlgmr.msra.gmra.mrb[48].mxu1 %v2039_v9  ;;  %v1971_v10 = vld [vmem:[#allocation2 + $0xd8] sm:$0xf]  ;;  %v4087_v3 = vld [vmem:[%s5151_s3 + $0x180] sm:$0xff]   ;;  %v5025_v15 = vld [vmem:[%s5151_s3 + $0x210] sm:$0xff]  }
 0x250   :  { %v1899_v29 = vld [vmem:[#allocation2 + $0xe8] sm:$0x8]  ;;  %3801 = vmatpush3.bf16.msra.mxu0 %v4743_v4  ;;  %3796 = vmatprep.mubr.bf16.mxu0 %v2057_v19  ;;  %v2046_v4 = vrot.slane %v4894_v1, 4  ;;  %v2058_v54 = vrot.slane %v1971_v10, 4  ;;  %v4092_v37 = vld [vmem:[%s5151_s3 + $0x1d0] sm:$0xff]   ;;  %v4095_v9 = vld [vmem:[%s5151_s3 + $0x1d8] sm:$0xff]  }
 0x251   :  { %v1900_v8 = vsel %vm4478_vm4, 0, %v1899_v29  ;;  %2260 = vmatprep.mubr.bf16.mxu1 %v2049_v40  ;;  %3573 = vmatpush3.bf16.msra.mxu1 %v4063_v7  ;;  %v4094_v7 = vld [vmem:[%s5151_s3 + $0x218] sm:$0xff]   ;;  %v4093_v41 = vld [vmem:[%s5151_s3 + $0x190] sm:$0xff]   ;;  %v4098_v19 = vld [vmem:[%s5151_s3 + $0x1e0] sm:$0xff]  }
 0x252   :  { %1901 = vst [vmem:[#allocation2 + $0xe8] sm:$0x8] %v1900_v8  ;;  %3802 = vmatprep.subr.bf16.mxu0 %v4064_v18  ;;  %3574 = vmatprep.subr.bf16.mxu1 %v4065_v57  ;;  %v2047_v14 = vsel %vm481_vm2, %v2038_v36, %v2046_v4  ;;  %v2053_v52 = vsel %vm481_vm2, %v2046_v4, %v2052_v59  ;;  %v4089_v36 = vld [vmem:[%s5151_s3 + $0x1c8] sm:$0xff]   ;;  %v4096_v57 = vld [vmem:[%s5151_s3 + $0x198] sm:$0xff]   ;;  %v4099_v29 = vld [vmem:[%s5151_s3 + $0x1a0] sm:$0xff]  }
 0x253   :  { %v2059_v47 = vsel %vm481_vm2, %v2052_v59, %v2058_v54  ;;  %v4101_v40 = vld [vmem:[%s5151_s3 + $0x1e8] sm:$0xff]   ;;  %v4103_v8 = vld [vmem:[%s5151_s3 + $0x230] sm:$0xff]   ;;  %v4106_v4 = vld [vmem:[%s5151_s3 + $0x238] sm:$0xff]  }
 0x254   :  { %3803 = vmatpush3.bf16.msra.mxu0 %v4064_v18  ;;  %v4097_v18 = vld [vmem:[%s5151_s3 + $0x220] sm:$0xff]   ;;  %v4107_v5 = vld [vmem:[%s5151_s3 + $0x1f8] sm:$0xff]  }
 0x255   :  { %3575 = vmatpush3.bf16.msra.mxu1 %v4066_v12  ;;  %3804 = vmatprep.subr.bf16.mxu0 %v4067_v23  ;;  %v4102_v12 = vld [vmem:[%s5151_s3 + $0x1a8] sm:$0xff]  }
 0x256   :  { %3576 = vmatprep.subr.bf16.mxu1 %v4068_v30  ;;  %v4105_v30 = vld [vmem:[%s5151_s3 + $0x1b0] sm:$0xff]  }
 0x257   :  { %2261 = vmatmul.mubr.bf16.gmra.mrb[52].mxu1 %v2047_v14 }
 0x258   :  { %3805 = vmatpush3.bf16.msra.mxu0 %v4067_v23  ;;  %2268 = vmatprep.mubr.bf16.mxu1 %v2055_v20  ;;  %v4104_v23 = vld [vmem:[%s5151_s3 + $0x1f0] sm:$0xff]  }
 0x259   :  { %v1973_v48 = vld [vmem:[#allocation2 + $0xe8] sm:$0xf]  ;;  %3577 = vmatpush3.bf16.msra.mxu1 %v4069_v61  ;;  %3806 = vmatprep.subr.bf16.mxu0 %v4070_v13  ;;  %v4108_v61 = vld [vmem:[%s5151_s3 + $0x1b8] sm:$0xff]  }
 0x25a   :  { %v2062_v26 = vrot.slane %v1973_v48, 4  ;;  %3578 = vmatprep.subr.bf16.mxu1 %v4071_v16 }
 0x25c   :  { %v2063_v42 = vsel %vm481_vm2, %v2056_v17, %v2062_v26  ;;  %3807 = vmatpush3.bf16.msra.mxu0 %v4070_v13  ;;  %v4090_v17 = vld [vmem:[%s5151_s3 + $0x188] sm:$0xff]  }
 0x25d   :  { %3797 = vmatmul.mubr.bf16.gmra.mrb[28].mxu0 %v2063_v42  ;;  %3579 = vmatpush3.bf16.msra.mxu1 %v4072_v63 }
 0x25e   :  { %3816 = vmatprep.mubr.bf16.mxu0 %v1910_v34  ;;  %3808 = vmatprep.subr.bf16.mxu0 %v4073_v24 }
 0x25f   :  { %2269 = vmatmul.mubr.bf16.gmra.mrb[56].mxu1 %v2053_v52  ;;  %3580 = vmatprep.subr.bf16.mxu1 %v4074_v46 }
 0x260   :  { %3809 = vmatpush3.bf16.msra.mxu0 %v4073_v24  ;;  %2276 = vmatprep.mubr.bf16.mxu1 %v2061_v45 }
 0x261   :  { %3581 = vmatpush3.bf16.msra.mxu1 %v4075_v39  ;;  %3810 = vmatprep.subr.bf16.mxu0 %v4076_v43 }
 0x262   :  { %3582 = vmatprep.subr.bf16.mxu1 %v4077_v33 }
 0x264   :  { %3811 = vmatpush3.bf16.msra.mxu0 %v4076_v43 }
 0x265   :  { %3583 = vmatpush3.bf16.msra.mxu1 %v4078_v49  ;;  %3812 = vmatprep.subr.bf16.mxu0 %v4079_v51 }
 0x266   :  { %3584 = vmatprep.subr.bf16.mxu1 %v4080_v6 }
 0x267   :  { %2277 = vmatmul.mubr.bf16.gmra.mrb[60].mxu1 %v2059_v47 }
 0x268   :  { %3813 = vmatpush3.bf16.msra.mxu0 %v4079_v51  ;;  %2526 = vmatprep.mubr.bf16.mxu1 %v1909_v60 }
 0x269   :  { %3585 = vmatpush3.bf16.msra.mxu1 %v4081_v55  ;;  %3814 = vmatprep.subr.bf16.mxu0 %v4082_v62 }
 0x26a   :  { %3586 = vmatprep.subr.bf16.mxu1 %v4083_v53 }
 0x26c   :  { %3815 = vmatpush3.bf16.msra.mxu0 %v4082_v62 }
 0x26d   :  { %3587 = vmatpush3.bf16.msra.mxu1 %v4084_v31  ;;  %3824 = vmatprep.subr.bf16.mxu0 %v5001_v56 }
 0x26e   :  { %3624 = vmatprep.subr.bf16.mxu1 %v4086_v0 }
 0x26f   :  { %3817 = vmatmul.mubr.bf16.vlgmr.msra.gmra.mrb[24].mxu0 %v4850_v11 }
 0x270   :  { %3820 = vmatprep.mubr.bf16.mxu0 %v4905_v32  ;;  %3825 = vmatpush3.bf16.msra.mxu0 %v5001_v56 }
 0x271   :  { %2527 = vmatmul.mubr.bf16.vlgmr.msra.gmra.mrb[64].mxu1 %v1908_v22  ;;  %3826 = vmatprep.subr.bf16.mxu0 %v5010_v38 }
 0x272   :  { %2534 = vmatprep.mubr.bf16.mxu1 %v4824_v25  ;;  %3625 = vmatpush3.bf16.msra.mxu1 %v4087_v3 }
 0x273   :  { %3626 = vmatprep.subr.bf16.mxu1 %v4089_v36 }
 0x274   :  { %3827 = vmatpush3.bf16.msra.mxu0 %v5010_v38 }
 0x275   :  { %3828 = vmatprep.subr.bf16.mxu0 %v5025_v15 }
 0x276   :  { %3627 = vmatpush3.bf16.msra.mxu1 %v4090_v17 }
 0x277   :  { %3821 = vmatmul.mubr.bf16.gmra.mrb[28].mxu0 %v4908_v2  ;;  %3628 = vmatprep.subr.bf16.mxu1 %v4092_v37 }
 0x278   :  { %3829 = vmatpush3.bf16.msra.mxu0 %v5025_v15  ;;  %3840 = vmatprep.mubr.bf16.mxu0 %v4850_v11  ;;  %v4100_v11 = vld [vmem:[%s5151_s3 + $0x228] sm:$0xff]  }
 0x279   :  { %2535 = vmatmul.mubr.bf16.gmra.mrb[68].mxu1 %v4841_v50  ;;  %3830 = vmatprep.subr.bf16.mxu0 %v4094_v7 }
 0x27a   :  { %2542 = vmatprep.mubr.bf16.mxu1 %v4880_v28  ;;  %3629 = vmatpush3.bf16.msra.mxu1 %v4093_v41 }
 0x27b   :  { %3630 = vmatprep.subr.bf16.mxu1 %v4095_v9 }
 0x27c   :  { %3831 = vmatpush3.bf16.msra.mxu0 %v4094_v7 }
 0x27d   :  { %3832 = vmatprep.subr.bf16.mxu0 %v4097_v18 }
 0x27e   :  { %3631 = vmatpush3.bf16.msra.mxu1 %v4096_v57 }
 0x27f   :  { %3632 = vmatprep.subr.bf16.mxu1 %v4098_v19 }
 0x280   :  { %3833 = vmatpush3.bf16.msra.mxu0 %v4097_v18 }
 0x281   :  { %2543 = vmatmul.mubr.bf16.gmra.mrb[72].mxu1 %v4894_v1  ;;  %3834 = vmatprep.subr.bf16.mxu0 %v4100_v11 }
 0x282   :  { %2550 = vmatprep.mubr.bf16.mxu1 %v4883_v27  ;;  %3633 = vmatpush3.bf16.msra.mxu1 %v4099_v29 }
 0x283   :  { %3634 = vmatprep.subr.bf16.mxu1 %v4101_v40 }
 0x284   :  { %3835 = vmatpush3.bf16.msra.mxu0 %v4100_v11 }
 0x285   :  { %3836 = vmatprep.subr.bf16.mxu0 %v4103_v8 }
 0x286   :  { %3635 = vmatpush3.bf16.msra.mxu1 %v4102_v12 }
 0x287   :  { %3636 = vmatprep.subr.bf16.mxu1 %v4104_v23 }
 0x288   :  { %3837 = vmatpush3.bf16.msra.mxu0 %v4103_v8 }
 0x289   :  { %2551 = vmatmul.mubr.bf16.gmra.mrb[76].mxu1 %v4897_v44  ;;  %3838 = vmatprep.subr.bf16.mxu0 %v4106_v4 }
 0x28a   :  { %3637 = vmatpush3.bf16.msra.mxu1 %v4105_v30  ;;  %2851 = vmatprep.mubr.bf16.mxu1 %v4824_v25  ;;  %v2625_v25 = vld [vmem:[#allocation2 + $0xe0] sm:$0xff] }
 0x28b   :  { %3638 = vmatprep.subr.bf16.mxu1 %v4107_v5 }
 0x28c   :  { %3839 = vmatpush3.bf16.msra.mxu0 %v4106_v4 }
 0x28e   :  { %3639 = vmatpush3.bf16.msra.mxu1 %v4108_v61 }
 0x28f   :  { %3841 = vmatmul.mubr.bf16.vlgmr.msra.gmra.mrb[24].mxu0 %v4905_v32  ;;  %3848 = vmatprep.subr.bf16.mxu1 %v5001_v56 }
 0x291   :  { %2852 = vmatmul.mubr.bf16.vlgmr.msra.gmra.mrb[80].mxu1 %v4841_v50  ;;  %v2624_v50 = vld [vmem:[#allocation2 + $0xd8] sm:$0xff] }
 0x292   :  { %2859 = vmatprep.mubr.bf16.mxu1 %v4880_v28  ;;  %3856 = vmatpush3.bf16.msra.mxu1 %v5001_v56  ;;  %v2626_v28 = vld [vmem:[#allocation2 + $0xe8] sm:$0xff] }
 0x293   :  { %3849 = vmatprep.subr.bf16.mxu1 %v5010_v38 }
 0x296   :  { %3857 = vmatpush3.bf16.msra.mxu1 %v5010_v38 }
 0x297   :  { %3850 = vmatprep.subr.bf16.mxu1 %v5025_v15 }
 0x299   :  { %2860 = vmatmul.mubr.bf16.gmra.mrb[84].mxu1 %v4894_v1 }
 0x29a   :  { %2867 = vmatprep.mubr.bf16.mxu1 %v4883_v27  ;;  %3858 = vmatpush3.bf16.msra.mxu1 %v5025_v15 }
 0x29b   :  { %3851 = vmatprep.subr.bf16.mxu1 %v4094_v7 }
 0x29e   :  { %3859 = vmatpush3.bf16.msra.mxu1 %v4094_v7 }
 0x29f   :  { %3852 = vmatprep.subr.bf16.mxu1 %v4097_v18 }
 0x2a1   :  { %2868 = vmatmul.mubr.bf16.gmra.mrb[88].mxu1 %v4897_v44 }
 0x2a2   :  { %2875 = vmatprep.mubr.bf16.mxu1 %v2625_v25  ;;  %3860 = vmatpush3.bf16.msra.mxu1 %v4097_v18 }
 0x2a3   :  { %3853 = vmatprep.subr.bf16.mxu1 %v4100_v11 }
 0x2a6   :  { %3861 = vmatpush3.bf16.msra.mxu1 %v4100_v11 }
 0x2a7   :  { %3854 = vmatprep.subr.bf16.mxu1 %v4103_v8 }
 0x2a9   :  { %2876 = vmatmul.mubr.bf16.gmra.mrb[92].mxu1 %v2624_v50 }
 0x2aa   :  { %3862 = vmatpush3.bf16.msra.mxu1 %v4103_v8  ;;  %3844 = vmatprep.mubr.bf16.mxu1 %v4908_v2 }
 0x2ab   :  { %3855 = vmatprep.subr.bf16.mxu1 %v4106_v4 }
 0x2ae   :  { %3863 = vmatpush3.bf16.msra.mxu1 %v4106_v4 }
 0x2b1   :  { %3845 = vmatmul.mubr.bf16.vlgmr.msra.gmra.mrb[96].mxu1 %v2626_v28 }
 0x322   :  { %v3536_v27 = vpop.f32.mrb[48].mxu1 }
 0x323   :  { %v3537_v1 = vpop.f32.mrb[49].mxu1 }
 0x324   :  { %v3538_v32 = vadd.f32 %v3537_v1, %v3536_v27  ;;  %v3539_v13 = vpop.f32.mrb[50].mxu1 }
 0x325   :  { %v3540_v44 = vpop.f32.mrb[51].mxu1 }
 0x326   :  { %v3541_v14 = vadd.f32 %v3540_v44, %v3539_v13 }
 0x32a   :  { %v3542_v16 = vpop.f32.mrb[52].mxu1 }
 0x32b   :  { %v3543_v20 = vpop.f32.mrb[53].mxu1 }
 0x32c   :  { %v3544_v35 = vadd.f32 %v3543_v20, %v3542_v16  ;;  %v3545_v48 = vpop.f32.mrb[54].mxu1 }
 0x32d   :  { %v3546_v63 = vpop.f32.mrb[55].mxu1 }
 0x32e   :  { %v3547_v26 = vadd.f32 %v3546_v63, %v3545_v48 }
 0x332   :  { %v3548_v24 = vpop.f32.mrb[56].mxu1 }
 0x333   :  { %v3549_v59 = vpop.f32.mrb[57].mxu1 }
 0x334   :  { %v3550_v46 = vadd.f32 %v3549_v59, %v3548_v24  ;;  %v3551_v2 = vpop.f32.mrb[58].mxu1 }
 0x335   :  { %v3552_v21 = vpop.f32.mrb[59].mxu1 }
 0x336   :  { %v3553_v42 = vadd.f32 %v3552_v21, %v3551_v2 }
 0x33a   :  { %v3554_v34 = vpop.f32.mrb[60].mxu1 }
 0x33b   :  { %v3555_v39 = vpop.f32.mrb[61].mxu1 }
 0x33c   :  { %v3556_v43 = vadd.f32 %v3555_v39, %v3554_v34  ;;  %v3557_v52 = vpop.f32.mrb[62].mxu1 }
 0x33d   :  { %v3558_v33 = vpop.f32.mrb[63].mxu1 }
 0x33e   :  { %v3559_v45 = vadd.f32 %v3558_v33, %v3557_v52 }
 0x344   :  { %v3588_v10 = vpop.f32.mrb[64].mxu1 }
 0x345   :  { %v3589_v49 = vpop.f32.mrb[65].mxu1 }
 0x346   :  { %v3590_v51 = vadd.f32 %v3589_v49, %v3588_v10  ;;  %v3591_v54 = vpop.f32.mrb[66].mxu1 }
 0x347   :  { %v3592_v6 = vpop.f32.mrb[67].mxu1 }
 0x348   :  { %v3891_v55 = vadd.f32 %v3590_v51, %v3538_v32  ;;  %v3593_v62 = vadd.f32 %v3592_v6, %v3591_v54 }
 0x34a   :  { %v3897_v47 = vadd.f32 %v3593_v62, %v3541_v14  ;;  %v3822_v53 = vpop.f32.mrb[28].mxu0 }
 0x34b   :  { %v2609_v60 = vpop.f32.mrb[29].mxu0 }
 0x34c   :  { %v3594_v31 = vpop.f32.mrb[68].mxu1  ;;  %v3823_v56 = vpop.f32.mrb[30].mxu0 }
 0x34d   :  { %v3595_v0 = vpop.f32.mrb[69].mxu1  ;;  %v2612_v38 = vpop.f32.mrb[31].mxu0 }
 0x34e   :  { %v3596_v3 = vadd.f32 %v3595_v0, %v3594_v31  ;;  %v3597_v36 = vpop.f32.mrb[70].mxu1 }
 0x34f   :  { %v3598_v22 = vpop.f32.mrb[71].mxu1 }
 0x350   :  { %v3888_v15 = vadd.f32 %v3596_v3, %v3544_v35  ;;  %v3599_v17 = vadd.f32 %v3598_v22, %v3597_v36 }
 0x352   :  { %v3894_v37 = vadd.f32 %v3599_v17, %v3547_v26 }
 0x354   :  { %v3600_v7 = vpop.f32.mrb[72].mxu1 }
 0x355   :  { %v3601_v41 = vpop.f32.mrb[73].mxu1 }
 0x356   :  { %v3602_v9 = vadd.f32 %v3601_v41, %v3600_v7  ;;  %v3603_v18 = vpop.f32.mrb[74].mxu1 }
 0x357   :  { %v3604_v57 = vpop.f32.mrb[75].mxu1 }
 0x358   :  { %v3904_v19 = vadd.f32 %v3602_v9, %v3550_v46  ;;  %v3605_v11 = vadd.f32 %v3604_v57, %v3603_v18 }
 0x35a   :  { %v3912_v29 = vadd.f32 %v3605_v11, %v3553_v42  ;;  %v3905_v40 = vadd.f32 %v3904_v19, %v2609_v60 }
 0x35c   :  { %v3606_v8 = vpop.f32.mrb[76].mxu1  ;;  %v3913_v12 = vadd.f32 %v3912_v29, %v2612_v38 }
 0x35d   :  { %v3607_v23 = vpop.f32.mrb[77].mxu1 }
 0x35e   :  { %v3608_v4 = vadd.f32 %v3607_v23, %v3606_v8  ;;  %v3609_v30 = vpop.f32.mrb[78].mxu1 }
 0x35f   :  { %v3610_v5 = vpop.f32.mrb[79].mxu1 }
 0x360   :  { %v3900_v61 = vadd.f32 %v3608_v4, %v3556_v43  ;;  %v3611_v25 = vadd.f32 %v3610_v5, %v3609_v30 }
 0x362   :  { %v3908_v50 = vadd.f32 %v3611_v25, %v3559_v45  ;;  %v3842_v28 = vpop.f32.mrb[24].mxu0  ;;  %v3901_v27 = vadd.f32 %v3900_v61, %v3822_v53 }
 0x363   :  { %v2918_v1 = vpop.f32.mrb[25].mxu0 }
 0x364   :  { %v3640_v32 = vpop.f32.mrb[80].mxu1  ;;  %v3843_v13 = vpop.f32.mrb[26].mxu0  ;;  %v3909_v44 = vadd.f32 %v3908_v50, %v3823_v56 }
 0x365   :  { %v3641_v14 = vpop.f32.mrb[81].mxu1  ;;  %v2921_v16 = vpop.f32.mrb[27].mxu0 }
 0x366   :  { %v3642_v20 = vadd.f32 %v3641_v14, %v3640_v32  ;;  %v3643_v35 = vpop.f32.mrb[82].mxu1 }
 0x367   :  { %v3644_v48 = vpop.f32.mrb[83].mxu1 }
 0x368   :  { %v3892_v63 = vadd.f32 %v3891_v55, %v3642_v20  ;;  %v3645_v26 = vadd.f32 %v3644_v48, %v3643_v35 }
 0x36a   :  { %v3893_v24 = vadd.f32 %v3892_v63, %v2918_v1  ;;  %v3898_v59 = vadd.f32 %v3897_v47, %v3645_v26 }
 0x36c   :  { %v2957_v46 = vadd.f32 %v3893_v24, %v4772_v58  ;;  %v3899_v2 = vadd.f32 %v3898_v59, %v2921_v16  ;;  %v3646_v21 = vpop.f32.mrb[84].mxu1 }
 0x36d   :  { %v3647_v42 = vpop.f32.mrb[85].mxu1 }
 0x36e   :  { %v2965_v34 = vmax.f32 %v2957_v46, 0.0  ;;  %v2958_v39 = vadd.f32 %v3899_v2, %v4772_v58  ;;  %v3648_v43 = vadd.f32 %v3647_v42, %v3646_v21  ;;  %v3649_v52 = vpop.f32.mrb[86].mxu1 }
 0x36f   :  { %v3650_v33 = vpop.f32.mrb[87].mxu1 }
 0x370   :  { %2973 = vst.msk [vmem:[%s5154_s6 + $0x40] sm:$0xff] %vm1642_vm0, %v2965_v34  ;;  %v2966_v45 = vmax.f32 %v2958_v39, 0.0  ;;  %v3889_v10 = vadd.f32 %v3888_v15, %v3648_v43  ;;  %v3651_v49 = vadd.f32 %v3650_v33, %v3649_v52 }
 0x372   :  { %2974 = vst.msk [vmem:[%s5154_s6 + $0x48] sm:$0xff] %vm1642_vm0, %v2966_v45  ;;  %v3890_v51 = vadd.f32 %v3889_v10, %v3842_v28  ;;  %v3895_v54 = vadd.f32 %v3894_v37, %v3651_v49  ;;  %v4113_v28 = vld [vmem:[%s5153_s4] ss:$0 sm:$0xff] }
 0x374   :  { %v2959_v6 = vadd.f32 %v3890_v51, %v4772_v58  ;;  %v3896_v55 = vadd.f32 %v3895_v54, %v3843_v13  ;;  %v3652_v62 = vpop.f32.mrb[88].mxu1 }
 0x375   :  { %v3653_v47 = vpop.f32.mrb[89].mxu1 }
 0x376   :  { %v2967_v53 = vmax.f32 %v2959_v6, 0.0  ;;  %v2960_v60 = vadd.f32 %v3896_v55, %v4772_v58  ;;  %v3654_v31 = vadd.f32 %v3653_v47, %v3652_v62  ;;  %v3655_v56 = vpop.f32.mrb[90].mxu1 }
 0x377   :  { %v3656_v0 = vpop.f32.mrb[91].mxu1 }
 0x378   :  { %2975 = vst.msk [vmem:[%s5154_s6 + $0x50] sm:$0xff] %vm1642_vm0, %v2967_v53  ;;  %v2968_v38 = vmax.f32 %v2960_v60, 0.0  ;;  %v3657_v3 = vadd.f32 %v3656_v0, %v3655_v56  ;;  %v3906_v36 = vadd.f32 %v3905_v40, %v3654_v31 }
 0x37a   :  { %2976 = vst.msk [vmem:[%s5154_s6 + $0x58] sm:$0xff] %vm1642_vm0, %v2968_v38  ;;  %v3914_v22 = vadd.f32 %v3913_v12, %v3657_v3 }
 0x37c   :  { %v3658_v15 = vpop.f32.mrb[92].mxu1 }
 0x37d   :  { %v3659_v17 = vpop.f32.mrb[93].mxu1 }
 0x37e   :  { %v3660_v37 = vadd.f32 %v3659_v17, %v3658_v15  ;;  %v3661_v7 = vpop.f32.mrb[94].mxu1 }
 0x37f   :  { %v3662_v41 = vpop.f32.mrb[95].mxu1 }
 0x380   :  { %v3663_v9 = vadd.f32 %v3662_v41, %v3661_v7  ;;  %v3902_v18 = vadd.f32 %v3901_v27, %v3660_v37 }
 0x382   :  { %v3910_v57 = vadd.f32 %v3909_v44, %v3663_v9 }
 0x384   :  { %v3846_v19 = vpop.f32.mrb[96].mxu1 }
 0x385   :  { %v3903_v11 = vadd.f32 %v3902_v18, %v3846_v19  ;;  %v2934_v29 = vpop.f32.mrb[97].mxu1 }
 0x386   :  { %v3907_v8 = vadd.f32 %v3906_v36, %v2934_v29  ;;  %v3847_v23 = vpop.f32.mrb[98].mxu1 }
 0x387   :  { %v2963_v40 = vadd.f32 %v3903_v11, %v4772_v58  ;;  %v3911_v4 = vadd.f32 %v3910_v57, %v3847_v23  ;;  %v2937_v30 = vpop.f32.mrb[99].mxu1 }
 0x388   :  { %v2961_v5 = vadd.f32 %v3907_v8, %v4772_v58  ;;  %v3915_v12 = vadd.f32 %v3914_v22, %v2937_v30 }
 0x389   :  { %v2971_v61 = vmax.f32 %v2963_v40, 0.0  ;;  %v2964_v25 = vadd.f32 %v3911_v4, %v4772_v58 }
 0x38a   :  { %v2969_v50 = vmax.f32 %v2961_v5, 0.0  ;;  %v2962_v27 = vadd.f32 %v4113_v28, %v3915_v12 }
 0x38b   :  { %2979 = vst.msk [vmem:[%s5154_s6 + $0x70] sm:$0xff] %vm1642_vm0, %v2971_v61  ;;  %v2972_v1 = vmax.f32 %v2964_v25, 0.0 }
 0x38c   :  { %2977 = vst.msk [vmem:[%s5154_s6 + $0x60] sm:$0xff] %vm1642_vm0, %v2969_v50  ;;  %v2970_v32 = vmax.f32 %v2962_v27, 0.0 }
 0x38d   :  { %2980 = vst.msk [vmem:[%s5154_s6 + $0x78] sm:$0xff] %vm1642_vm0, %v2972_v1 }
 0x38e   :  { %2978 = vst.msk [vmem:[%s5154_s6 + $0x68] sm:$0xff] %vm1642_vm0, %v2970_v32 }

</bundles_post_ra>
